<compile_context>
chip_gen: v5e
topology: v5e:2x2
jax: 0.10.0
libtpu: 0.0.40
codegen_flags: <defaults>
</compile_context>

<pallas_src>
import jax
import jax.numpy as jnp
from jax import lax
from jax.experimental import pallas as pl
from jax.experimental.pallas import tpu as pltpu

# Small, self-consistent shapes (the reference module mixes 768/4096/1024
# in_features; here hidden H is used consistently for the CLS -> classifier).
B, S, H, F, VOCAB, C = 2, 8, 64, 128, 100, 4   # batch, seq, hidden, ffn, vocab, classes
N_LAYERS = 2
CPAD = 128                                      # lane-dense padded classifier width
SCALE = 1.0 / float(H) ** 0.5


def _layernorm(x, g, b, eps=1e-5):
    mu = jnp.mean(x, axis=-1, keepdims=True)
    var = jnp.mean((x - mu) ** 2, axis=-1, keepdims=True)
    return (x - mu) * jax.lax.rsqrt(var + eps) * g + b


def fused_roberta_kernel(x_ref, bias_ref,
                         wqkv_ref, bqkv_ref, wo_ref, bo_ref,
                         ln1g_ref, ln1b_ref,
                         w1_ref, b1_ref, w2_ref, b2_ref,
                         ln2g_ref, ln2b_ref,
                         clsw_ref, clsb_ref,
                         out_ref):
    x2d = x_ref[...]                              # (B*S, H) f32
    bias = bias_ref[...][:, None, :]              # (B, 1, S) loop-invariant mask bias

    def layer(i, h):
        hb = h.astype(jnp.bfloat16)
        # Packed QKV: one (B*S, H) @ (H, 3H) MXU pass, f32 accumulation.
        qkv = jnp.dot(hb, wqkv_ref[i],
                      preferred_element_type=jnp.float32) + bqkv_ref[i]
        q = qkv[:, 0 * H:1 * H].reshape(B, S, H)
        k = qkv[:, 1 * H:2 * H].reshape(B, S, H)
        v = qkv[:, 2 * H:3 * H].reshape(B, S, H)

        # --- attention (single head; synthetic stand-in for pretrained l1) ---
        scores = jnp.einsum('bqd,bkd->bqk', q, k,
                            preferred_element_type=jnp.float32) * SCALE + bias
        m = jnp.max(scores, axis=-1, keepdims=True)
        p = jnp.exp(scores - m)
        p = p * pl.reciprocal(jnp.sum(p, axis=-1, keepdims=True), approx=True)
        ctx = jnp.einsum('bqk,bkd->bqd', p, v,
                         preferred_element_type=jnp.float32)

        attn = jnp.dot(ctx.reshape(B * S, H).astype(jnp.bfloat16), wo_ref[i],
                       preferred_element_type=jnp.float32) + bo_ref[i]
        h1 = _layernorm(h + attn, ln1g_ref[i], ln1b_ref[i])

        # --- feed-forward (flat 2-D dots) ---
        ff = jnp.dot(h1.astype(jnp.bfloat16), w1_ref[i],
                     preferred_element_type=jnp.float32) + b1_ref[i]
        # TODO(synk): HF RoBERTa uses exact erf-GELU; tanh approximation kept here.
        ff = jax.nn.gelu(ff, approximate=True)
        ff = jnp.dot(ff.astype(jnp.bfloat16), w2_ref[i],
                     preferred_element_type=jnp.float32) + b2_ref[i]
        return _layernorm(h1 + ff, ln2g_ref[i], ln2b_ref[i])

    h = lax.fori_loop(0, N_LAYERS, layer, x2d, unroll=True)

    # CLS token (rows 0, S, 2S, ...) -> classifier; output lane-padded to CPAD.
    cls = h.reshape(B, S, H)[:, 0, :].astype(jnp.bfloat16)        # (B, H)
    out_ref[...] = jnp.dot(cls, clsw_ref[...],
                           preferred_element_type=jnp.float32) + clsb_ref[...]


def _vmem():
    return pl.BlockSpec(memory_space=pltpu.MemorySpace.VMEM)


def fused_forward(x2d, mask_bias, p):
    args = (x2d, mask_bias,
            p['wqkv'], p['bqkv'], p['wo'], p['bo'], p['ln1g'], p['ln1b'],
            p['w1'], p['b1'], p['w2'], p['b2'], p['ln2g'], p['ln2b'],
            p['cls_w'], p['cls_b'])

    flops = N_LAYERS * (2 * B * S * H * 3 * H       # packed QKV
                        + 4 * B * S * S * H         # scores + context
                        + 2 * B * S * H * H         # attn output proj
                        + 4 * B * S * H * F)        # FFN up + down
    flops += 2 * B * H * CPAD                       # classifier
    transcendentals = N_LAYERS * (B * S * S + B * S * F + 3 * B * S)
    bytes_accessed = sum(int(a.size) * a.dtype.itemsize for a in args) + B * CPAD * 4

    return pl.pallas_call(
        fused_roberta_kernel,
        out_shape=jax.ShapeDtypeStruct((B, CPAD), jnp.float32),
        in_specs=[_vmem() for _ in args],
        out_specs=_vmem(),
        cost_estimate=pl.CostEstimate(flops=flops,
                                      transcendentals=transcendentals,
                                      bytes_accessed=bytes_accessed),
    )(*args)


def init_params(key):
    ks = list(jax.random.split(key, 16))
    it = iter(ks)

    def nrm(shape, scale=0.02, dtype=jnp.float32):
        return (scale * jax.random.normal(next(it), shape)).astype(dtype)

    params = {
        'tok_emb': nrm((VOCAB, H)),
        'pos_emb': nrm((S, H)),
        # per-layer weights stacked along a leading layer axis; MXU weights bf16.
        'wqkv': nrm((N_LAYERS, H, 3 * H), dtype=jnp.bfloat16),
        'bqkv': jnp.zeros((N_LAYERS, 1, 3 * H), jnp.float32),
        'wo':   nrm((N_LAYERS, H, H), dtype=jnp.bfloat16),
        'bo':   jnp.zeros((N_LAYERS, 1, H), jnp.float32),
        'ln1g': jnp.ones((N_LAYERS, 1, H), jnp.float32),
        'ln1b': jnp.zeros((N_LAYERS, 1, H), jnp.float32),
        'w1':   nrm((N_LAYERS, H, F), dtype=jnp.bfloat16),
        'b1':   jnp.zeros((N_LAYERS, 1, F), jnp.float32),
        'w2':   nrm((N_LAYERS, F, H), dtype=jnp.bfloat16),
        'b2':   jnp.zeros((N_LAYERS, 1, H), jnp.float32),
        'ln2g': jnp.ones((N_LAYERS, 1, H), jnp.float32),
        'ln2b': jnp.zeros((N_LAYERS, 1, H), jnp.float32),
    }
    # Classifier, lane-padded from C=4 to CPAD=128 (zero columns) so the kernel's
    # only output store is lane-dense; the wrapper slices [:, :C].
    cls_w = nrm((H, C))
    params['cls_w'] = (jnp.zeros((H, CPAD), jnp.float32)
                       .at[:, :C].set(cls_w).astype(jnp.bfloat16))
    params['cls_b'] = jnp.zeros((1, CPAD), jnp.float32)
    return params


def roberta_forward(params, input_ids, attention_mask):
    # Glue: embedding lookup (gather) stays in plain JAX.
    x = jnp.take(params['tok_emb'], input_ids, axis=0) + params['pos_emb'][None, :, :]
    x2d = x.reshape(B * S, H).astype(jnp.float32)
    # Additive padding bias, precomputed once (key-axis broadcast inside kernel).
    mask_bias = (attention_mask.astype(jnp.float32) - 1.0) * 1e9        # (B, S)
    logits_padded = fused_forward(x2d, mask_bias, params)               # (B, CPAD)
    return logits_padded[:, :C]                                         # (B, C)


if __name__ == "__main__":
    key = jax.random.PRNGKey(0)
    pkey, dkey = jax.random.split(key)
    params = init_params(pkey)

    input_ids = jax.random.randint(dkey, (B, S), 0, VOCAB, dtype=jnp.int32)
    attention_mask = jnp.ones((B, S), jnp.int32).at[:, S - 2:].set(0)   # last 2 tokens padded

    logits = jax.jit(roberta_forward)(params, input_ids, attention_mask)
    jax.block_until_ready(logits)
    assert logits.shape == (B, C) and logits.dtype == jnp.float32
    print("KERNEL_OK")
</pallas_src>

<mosaic_0001>
module attributes {stable_mosaic.version = 11 : i64} {
  func.func @fused_roberta_kernel(%arg0: memref<16x64xf32, #tpu.memory_space<vmem>>, %arg1: memref<2x8xf32, #tpu.memory_space<vmem>>, %arg2: memref<2x64x192xbf16, #tpu.memory_space<vmem>>, %arg3: memref<2x1x192xf32, #tpu.memory_space<vmem>>, %arg4: memref<2x64x64xbf16, #tpu.memory_space<vmem>>, %arg5: memref<2x1x64xf32, #tpu.memory_space<vmem>>, %arg6: memref<2x1x64xf32, #tpu.memory_space<vmem>>, %arg7: memref<2x1x64xf32, #tpu.memory_space<vmem>>, %arg8: memref<2x64x128xbf16, #tpu.memory_space<vmem>>, %arg9: memref<2x1x128xf32, #tpu.memory_space<vmem>>, %arg10: memref<2x128x64xbf16, #tpu.memory_space<vmem>>, %arg11: memref<2x1x64xf32, #tpu.memory_space<vmem>>, %arg12: memref<2x1x64xf32, #tpu.memory_space<vmem>>, %arg13: memref<2x1x64xf32, #tpu.memory_space<vmem>>, %arg14: memref<64x128xbf16, #tpu.memory_space<vmem>>, %arg15: memref<1x128xf32, #tpu.memory_space<vmem>>, %arg16: memref<2x128xf32, #tpu.memory_space<vmem>>) attributes {dimension_semantics = [], scalar_prefetch = 0 : i64, scratch_operands = 0 : i64, tpu.core_type = #tpu.core_type<tc>} {
    %c0 = arith.constant 0 : index
    %c0_0 = arith.constant 0 : index
    %0 = vector.load %arg0[%c0, %c0_0] : memref<16x64xf32, #tpu.memory_space<vmem>>, vector<16x64xf32>
    %c0_1 = arith.constant 0 : index
    %c0_2 = arith.constant 0 : index
    %1 = vector.load %arg1[%c0_1, %c0_2] : memref<2x8xf32, #tpu.memory_space<vmem>>, vector<2x8xf32>
    %2 = vector.shape_cast %1 : vector<2x8xf32> to vector<2x1x8xf32>
    %c0_i32 = arith.constant 0 : i32
    %3 = arith.truncf %0 : vector<16x64xf32> to vector<16x64xbf16>
    %4 = arith.index_cast %c0_i32 : i32 to index
    %c0_3 = arith.constant 0 : index
    %c0_4 = arith.constant 0 : index
    %5 = vector.load %arg2[%4, %c0_3, %c0_4] : memref<2x64x192xbf16, #tpu.memory_space<vmem>>, vector<1x64x192xbf16>
    %6 = vector.shape_cast %5 : vector<1x64x192xbf16> to vector<64x192xbf16>
    %cst = arith.constant dense<0.000000e+00> : vector<16x192xf32>
    %7 = tpu.matmul %3, %6, %cst {dimension_numbers = #tpu.dot_dimension_numbers<[1], [0], [0], [1], [0, 0, 1, 1], [], []>} : vector<16x64xbf16>, vector<64x192xbf16>, vector<16x192xf32> -> vector<16x192xf32>
    %8 = arith.index_cast %c0_i32 : i32 to index
    %c0_5 = arith.constant 0 : index
    %c0_6 = arith.constant 0 : index
    %9 = vector.load %arg3[%8, %c0_5, %c0_6] : memref<2x1x192xf32, #tpu.memory_space<vmem>>, vector<1x1x192xf32>
    %10 = vector.shape_cast %9 : vector<1x1x192xf32> to vector<1x192xf32>
    %11 = vector.broadcast %10 : vector<1x192xf32> to vector<16x192xf32>
    %12 = arith.addf %7, %11 : vector<16x192xf32>
    %13 = vector.extract_strided_slice %12 {offsets = [0, 0], sizes = [16, 64], strides = [1, 1]} : vector<16x192xf32> to vector<16x64xf32>
    %14 = vector.shape_cast %13 : vector<16x64xf32> to vector<2x8x64xf32>
    %15 = vector.extract_strided_slice %12 {offsets = [0, 64], sizes = [16, 64], strides = [1, 1]} : vector<16x192xf32> to vector<16x64xf32>
    %16 = vector.shape_cast %15 : vector<16x64xf32> to vector<2x8x64xf32>
    %17 = vector.extract_strided_slice %12 {offsets = [0, 128], sizes = [16, 64], strides = [1, 1]} : vector<16x192xf32> to vector<16x64xf32>
    %18 = vector.shape_cast %17 : vector<16x64xf32> to vector<2x8x64xf32>
    "tpu.trace_start"() <{level = 10 : i32, message = "bqd,bkd->bqk"}> : () -> ()
    %cst_7 = arith.constant dense<0.000000e+00> : vector<2x8x8xf32>
    %19 = tpu.matmul %14, %16, %cst_7 {dimension_numbers = #tpu.dot_dimension_numbers<[2], [2], [1], [1], [0, 0, 0, 1, 1, 1], [0], [0]>} : vector<2x8x64xf32>, vector<2x8x64xf32>, vector<2x8x8xf32> -> vector<2x8x8xf32>
    "tpu.trace_stop"() : () -> ()
    %cst_8 = arith.constant 1.250000e-01 : f32
    %20 = vector.broadcast %cst_8 : f32 to vector<2x8x8xf32>
    %21 = arith.mulf %19, %20 : vector<2x8x8xf32>
    %22 = vector.broadcast %2 : vector<2x1x8xf32> to vector<2x8x8xf32>
    %23 = arith.addf %21, %22 : vector<2x8x8xf32>
    %cst_9 = arith.constant dense<0xFF800000> : vector<2x8xf32>
    %24 = vector.multi_reduction <maximumf>, %23, %cst_9 [2] : vector<2x8x8xf32> to vector<2x8xf32>
    %25 = vector.shape_cast %24 : vector<2x8xf32> to vector<2x8x1xf32>
    %26 = vector.broadcast %25 : vector<2x8x1xf32> to vector<2x8x8xf32>
    %27 = arith.subf %23, %26 : vector<2x8x8xf32>
    %28 = math.exp %27 : vector<2x8x8xf32>
    %cst_10 = arith.constant dense<0.000000e+00> : vector<2x8xf32>
    %29 = vector.multi_reduction <add>, %28, %cst_10 [2] : vector<2x8x8xf32> to vector<2x8xf32>
    %30 = vector.shape_cast %29 : vector<2x8xf32> to vector<2x8x1xf32>
    %31 = tpu.reciprocal %30 {approx = true} : vector<2x8x1xf32> -> vector<2x8x1xf32>
    %32 = vector.broadcast %31 : vector<2x8x1xf32> to vector<2x8x8xf32>
    %33 = arith.mulf %28, %32 : vector<2x8x8xf32>
    "tpu.trace_start"() <{level = 10 : i32, message = "bqk,bkd->bqd"}> : () -> ()
    %cst_11 = arith.constant dense<0.000000e+00> : vector<2x8x64xf32>
    %34 = tpu.matmul %33, %18, %cst_11 {dimension_numbers = #tpu.dot_dimension_numbers<[2], [1], [1], [2], [0, 0, 0, 1, 1, 2], [0], [0]>} : vector<2x8x8xf32>, vector<2x8x64xf32>, vector<2x8x64xf32> -> vector<2x8x64xf32>
    "tpu.trace_stop"() : () -> ()
    %35 = vector.shape_cast %34 : vector<2x8x64xf32> to vector<16x64xf32>
    %36 = arith.truncf %35 : vector<16x64xf32> to vector<16x64xbf16>
    %37 = arith.index_cast %c0_i32 : i32 to index
    %c0_12 = arith.constant 0 : index
    %c0_13 = arith.constant 0 : index
    %38 = vector.load %arg4[%37, %c0_12, %c0_13] : memref<2x64x64xbf16, #tpu.memory_space<vmem>>, vector<1x64x64xbf16>
    %39 = vector.shape_cast %38 : vector<1x64x64xbf16> to vector<64x64xbf16>
    %cst_14 = arith.constant dense<0.000000e+00> : vector<16x64xf32>
    %40 = tpu.matmul %36, %39, %cst_14 {dimension_numbers = #tpu.dot_dimension_numbers<[1], [0], [0], [1], [0, 0, 1, 1], [], []>} : vector<16x64xbf16>, vector<64x64xbf16>, vector<16x64xf32> -> vector<16x64xf32>
    %41 = arith.index_cast %c0_i32 : i32 to index
    %c0_15 = arith.constant 0 : index
    %c0_16 = arith.constant 0 : index
    %42 = vector.load %arg5[%41, %c0_15, %c0_16] : memref<2x1x64xf32, #tpu.memory_space<vmem>>, vector<1x1x64xf32>
    %43 = vector.shape_cast %42 : vector<1x1x64xf32> to vector<1x64xf32>
    %44 = vector.broadcast %43 : vector<1x64xf32> to vector<16x64xf32>
    %45 = arith.addf %40, %44 : vector<16x64xf32>
    %46 = arith.addf %0, %45 : vector<16x64xf32>
    %47 = arith.index_cast %c0_i32 : i32 to index
    %c0_17 = arith.constant 0 : index
    %c0_18 = arith.constant 0 : index
    %48 = vector.load %arg6[%47, %c0_17, %c0_18] : memref<2x1x64xf32, #tpu.memory_space<vmem>>, vector<1x1x64xf32>
    %49 = vector.shape_cast %48 : vector<1x1x64xf32> to vector<1x64xf32>
    %50 = arith.index_cast %c0_i32 : i32 to index
    %c0_19 = arith.constant 0 : index
    %c0_20 = arith.constant 0 : index
    %51 = vector.load %arg7[%50, %c0_19, %c0_20] : memref<2x1x64xf32, #tpu.memory_space<vmem>>, vector<1x1x64xf32>
    %52 = vector.shape_cast %51 : vector<1x1x64xf32> to vector<1x64xf32>
    %cst_21 = arith.constant dense<0.000000e+00> : vector<16xf32>
    %53 = vector.multi_reduction <add>, %46, %cst_21 [1] : vector<16x64xf32> to vector<16xf32>
    %54 = vector.shape_cast %53 : vector<16xf32> to vector<16x1xf32>
    %cst_22 = arith.constant 6.400000e+01 : f32
    %55 = vector.broadcast %cst_22 : f32 to vector<16x1xf32>
    %56 = arith.divf %54, %55 : vector<16x1xf32>
    %57 = vector.broadcast %56 : vector<16x1xf32> to vector<16x64xf32>
    %58 = arith.subf %46, %57 : vector<16x64xf32>
    %59 = arith.mulf %58, %58 : vector<16x64xf32>
    %cst_23 = arith.constant dense<0.000000e+00> : vector<16xf32>
    %60 = vector.multi_reduction <add>, %59, %cst_23 [1] : vector<16x64xf32> to vector<16xf32>
    %61 = vector.shape_cast %60 : vector<16xf32> to vector<16x1xf32>
    %cst_24 = arith.constant 6.400000e+01 : f32
    %62 = vector.broadcast %cst_24 : f32 to vector<16x1xf32>
    %63 = arith.divf %61, %62 : vector<16x1xf32>
    %64 = vector.broadcast %56 : vector<16x1xf32> to vector<16x64xf32>
    %65 = arith.subf %46, %64 : vector<16x64xf32>
    %cst_25 = arith.constant 9.99999974E-6 : f32
    %66 = vector.broadcast %cst_25 : f32 to vector<16x1xf32>
    %67 = arith.addf %63, %66 : vector<16x1xf32>
    %68 = math.rsqrt %67 : vector<16x1xf32>
    %69 = vector.broadcast %68 : vector<16x1xf32> to vector<16x64xf32>
    %70 = arith.mulf %65, %69 : vector<16x64xf32>
    %71 = vector.broadcast %49 : vector<1x64xf32> to vector<16x64xf32>
    %72 = arith.mulf %70, %71 : vector<16x64xf32>
    %73 = vector.broadcast %52 : vector<1x64xf32> to vector<16x64xf32>
    %74 = arith.addf %72, %73 : vector<16x64xf32>
    %75 = arith.truncf %74 : vector<16x64xf32> to vector<16x64xbf16>
    %76 = arith.index_cast %c0_i32 : i32 to index
    %c0_26 = arith.constant 0 : index
    %c0_27 = arith.constant 0 : index
    %77 = vector.load %arg8[%76, %c0_26, %c0_27] : memref<2x64x128xbf16, #tpu.memory_space<vmem>>, vector<1x64x128xbf16>
    %78 = vector.shape_cast %77 : vector<1x64x128xbf16> to vector<64x128xbf16>
    %cst_28 = arith.constant dense<0.000000e+00> : vector<16x128xf32>
    %79 = tpu.matmul %75, %78, %cst_28 {dimension_numbers = #tpu.dot_dimension_numbers<[1], [0], [0], [1], [0, 0, 1, 1], [], []>} : vector<16x64xbf16>, vector<64x128xbf16>, vector<16x128xf32> -> vector<16x128xf32>
    %80 = arith.index_cast %c0_i32 : i32 to index
    %c0_29 = arith.constant 0 : index
    %c0_30 = arith.constant 0 : index
    %81 = vector.load %arg9[%80, %c0_29, %c0_30] : memref<2x1x128xf32, #tpu.memory_space<vmem>>, vector<1x1x128xf32>
    %82 = vector.shape_cast %81 : vector<1x1x128xf32> to vector<1x128xf32>
    %83 = vector.broadcast %82 : vector<1x128xf32> to vector<16x128xf32>
    %84 = arith.addf %79, %83 : vector<16x128xf32>
    %85 = arith.mulf %84, %84 : vector<16x128xf32>
    %86 = arith.mulf %84, %85 : vector<16x128xf32>
    %cst_31 = arith.constant 4.471500e-02 : f32
    %87 = vector.broadcast %cst_31 : f32 to vector<16x128xf32>
    %88 = arith.mulf %87, %86 : vector<16x128xf32>
    %89 = arith.addf %84, %88 : vector<16x128xf32>
    %cst_32 = arith.constant 0.797884583 : f32
    %90 = vector.broadcast %cst_32 : f32 to vector<16x128xf32>
    %91 = arith.mulf %90, %89 : vector<16x128xf32>
    %92 = math.tanh %91 : vector<16x128xf32>
    %cst_33 = arith.constant 1.000000e+00 : f32
    %93 = vector.broadcast %cst_33 : f32 to vector<16x128xf32>
    %94 = arith.addf %93, %92 : vector<16x128xf32>
    %cst_34 = arith.constant 5.000000e-01 : f32
    %95 = vector.broadcast %cst_34 : f32 to vector<16x128xf32>
    %96 = arith.mulf %95, %94 : vector<16x128xf32>
    %97 = arith.mulf %84, %96 : vector<16x128xf32>
    %98 = arith.truncf %97 : vector<16x128xf32> to vector<16x128xbf16>
    %99 = arith.index_cast %c0_i32 : i32 to index
    %c0_35 = arith.constant 0 : index
    %c0_36 = arith.constant 0 : index
    %100 = vector.load %arg10[%99, %c0_35, %c0_36] : memref<2x128x64xbf16, #tpu.memory_space<vmem>>, vector<1x128x64xbf16>
    %101 = vector.shape_cast %100 : vector<1x128x64xbf16> to vector<128x64xbf16>
    %cst_37 = arith.constant dense<0.000000e+00> : vector<16x64xf32>
    %102 = tpu.matmul %98, %101, %cst_37 {dimension_numbers = #tpu.dot_dimension_numbers<[1], [0], [0], [1], [0, 0, 1, 1], [], []>} : vector<16x128xbf16>, vector<128x64xbf16>, vector<16x64xf32> -> vector<16x64xf32>
    %103 = arith.index_cast %c0_i32 : i32 to index
    %c0_38 = arith.constant 0 : index
    %c0_39 = arith.constant 0 : index
    %104 = vector.load %arg11[%103, %c0_38, %c0_39] : memref<2x1x64xf32, #tpu.memory_space<vmem>>, vector<1x1x64xf32>
    %105 = vector.shape_cast %104 : vector<1x1x64xf32> to vector<1x64xf32>
    %106 = vector.broadcast %105 : vector<1x64xf32> to vector<16x64xf32>
    %107 = arith.addf %102, %106 : vector<16x64xf32>
    %108 = arith.addf %74, %107 : vector<16x64xf32>
    %109 = arith.index_cast %c0_i32 : i32 to index
    %c0_40 = arith.constant 0 : index
    %c0_41 = arith.constant 0 : index
    %110 = vector.load %arg12[%109, %c0_40, %c0_41] : memref<2x1x64xf32, #tpu.memory_space<vmem>>, vector<1x1x64xf32>
    %111 = vector.shape_cast %110 : vector<1x1x64xf32> to vector<1x64xf32>
    %112 = arith.index_cast %c0_i32 : i32 to index
    %c0_42 = arith.constant 0 : index
    %c0_43 = arith.constant 0 : index
    %113 = vector.load %arg13[%112, %c0_42, %c0_43] : memref<2x1x64xf32, #tpu.memory_space<vmem>>, vector<1x1x64xf32>
    %114 = vector.shape_cast %113 : vector<1x1x64xf32> to vector<1x64xf32>
    %cst_44 = arith.constant dense<0.000000e+00> : vector<16xf32>
    %115 = vector.multi_reduction <add>, %108, %cst_44 [1] : vector<16x64xf32> to vector<16xf32>
    %116 = vector.shape_cast %115 : vector<16xf32> to vector<16x1xf32>
    %cst_45 = arith.constant 6.400000e+01 : f32
    %117 = vector.broadcast %cst_45 : f32 to vector<16x1xf32>
    %118 = arith.divf %116, %117 : vector<16x1xf32>
    %119 = vector.broadcast %118 : vector<16x1xf32> to vector<16x64xf32>
    %120 = arith.subf %108, %119 : vector<16x64xf32>
    %121 = arith.mulf %120, %120 : vector<16x64xf32>
    %cst_46 = arith.constant dense<0.000000e+00> : vector<16xf32>
    %122 = vector.multi_reduction <add>, %121, %cst_46 [1] : vector<16x64xf32> to vector<16xf32>
    %123 = vector.shape_cast %122 : vector<16xf32> to vector<16x1xf32>
    %cst_47 = arith.constant 6.400000e+01 : f32
    %124 = vector.broadcast %cst_47 : f32 to vector<16x1xf32>
    %125 = arith.divf %123, %124 : vector<16x1xf32>
    %126 = vector.broadcast %118 : vector<16x1xf32> to vector<16x64xf32>
    %127 = arith.subf %108, %126 : vector<16x64xf32>
    %cst_48 = arith.constant 9.99999974E-6 : f32
    %128 = vector.broadcast %cst_48 : f32 to vector<16x1xf32>
    %129 = arith.addf %125, %128 : vector<16x1xf32>
    %130 = math.rsqrt %129 : vector<16x1xf32>
    %131 = vector.broadcast %130 : vector<16x1xf32> to vector<16x64xf32>
    %132 = arith.mulf %127, %131 : vector<16x64xf32>
    %133 = vector.broadcast %111 : vector<1x64xf32> to vector<16x64xf32>
    %134 = arith.mulf %132, %133 : vector<16x64xf32>
    %135 = vector.broadcast %114 : vector<1x64xf32> to vector<16x64xf32>
    %136 = arith.addf %134, %135 : vector<16x64xf32>
    %c1_i32 = arith.constant 1 : i32
    %137 = arith.truncf %136 : vector<16x64xf32> to vector<16x64xbf16>
    %138 = arith.index_cast %c1_i32 : i32 to index
    %c0_49 = arith.constant 0 : index
    %c0_50 = arith.constant 0 : index
    %139 = vector.load %arg2[%138, %c0_49, %c0_50] : memref<2x64x192xbf16, #tpu.memory_space<vmem>>, vector<1x64x192xbf16>
    %140 = vector.shape_cast %139 : vector<1x64x192xbf16> to vector<64x192xbf16>
    %cst_51 = arith.constant dense<0.000000e+00> : vector<16x192xf32>
    %141 = tpu.matmul %137, %140, %cst_51 {dimension_numbers = #tpu.dot_dimension_numbers<[1], [0], [0], [1], [0, 0, 1, 1], [], []>} : vector<16x64xbf16>, vector<64x192xbf16>, vector<16x192xf32> -> vector<16x192xf32>
    %142 = arith.index_cast %c1_i32 : i32 to index
    %c0_52 = arith.constant 0 : index
    %c0_53 = arith.constant 0 : index
    %143 = vector.load %arg3[%142, %c0_52, %c0_53] : memref<2x1x192xf32, #tpu.memory_space<vmem>>, vector<1x1x192xf32>
    %144 = vector.shape_cast %143 : vector<1x1x192xf32> to vector<1x192xf32>
    %145 = vector.broadcast %144 : vector<1x192xf32> to vector<16x192xf32>
    %146 = arith.addf %141, %145 : vector<16x192xf32>
    %147 = vector.extract_strided_slice %146 {offsets = [0, 0], sizes = [16, 64], strides = [1, 1]} : vector<16x192xf32> to vector<16x64xf32>
    %148 = vector.shape_cast %147 : vector<16x64xf32> to vector<2x8x64xf32>
    %149 = vector.extract_strided_slice %146 {offsets = [0, 64], sizes = [16, 64], strides = [1, 1]} : vector<16x192xf32> to vector<16x64xf32>
    %150 = vector.shape_cast %149 : vector<16x64xf32> to vector<2x8x64xf32>
    %151 = vector.extract_strided_slice %146 {offsets = [0, 128], sizes = [16, 64], strides = [1, 1]} : vector<16x192xf32> to vector<16x64xf32>
    %152 = vector.shape_cast %151 : vector<16x64xf32> to vector<2x8x64xf32>
    "tpu.trace_start"() <{level = 10 : i32, message = "bqd,bkd->bqk"}> : () -> ()
    %cst_54 = arith.constant dense<0.000000e+00> : vector<2x8x8xf32>
    %153 = tpu.matmul %148, %150, %cst_54 {dimension_numbers = #tpu.dot_dimension_numbers<[2], [2], [1], [1], [0, 0, 0, 1, 1, 1], [0], [0]>} : vector<2x8x64xf32>, vector<2x8x64xf32>, vector<2x8x8xf32> -> vector<2x8x8xf32>
    "tpu.trace_stop"() : () -> ()
    %cst_55 = arith.constant 1.250000e-01 : f32
    %154 = vector.broadcast %cst_55 : f32 to vector<2x8x8xf32>
    %155 = arith.mulf %153, %154 : vector<2x8x8xf32>
    %156 = vector.broadcast %2 : vector<2x1x8xf32> to vector<2x8x8xf32>
    %157 = arith.addf %155, %156 : vector<2x8x8xf32>
    %cst_56 = arith.constant dense<0xFF800000> : vector<2x8xf32>
    %158 = vector.multi_reduction <maximumf>, %157, %cst_56 [2] : vector<2x8x8xf32> to vector<2x8xf32>
    %159 = vector.shape_cast %158 : vector<2x8xf32> to vector<2x8x1xf32>
    %160 = vector.broadcast %159 : vector<2x8x1xf32> to vector<2x8x8xf32>
    %161 = arith.subf %157, %160 : vector<2x8x8xf32>
    %162 = math.exp %161 : vector<2x8x8xf32>
    %cst_57 = arith.constant dense<0.000000e+00> : vector<2x8xf32>
    %163 = vector.multi_reduction <add>, %162, %cst_57 [2] : vector<2x8x8xf32> to vector<2x8xf32>
    %164 = vector.shape_cast %163 : vector<2x8xf32> to vector<2x8x1xf32>
    %165 = tpu.reciprocal %164 {approx = true} : vector<2x8x1xf32> -> vector<2x8x1xf32>
    %166 = vector.broadcast %165 : vector<2x8x1xf32> to vector<2x8x8xf32>
    %167 = arith.mulf %162, %166 : vector<2x8x8xf32>
    "tpu.trace_start"() <{level = 10 : i32, message = "bqk,bkd->bqd"}> : () -> ()
    %cst_58 = arith.constant dense<0.000000e+00> : vector<2x8x64xf32>
    %168 = tpu.matmul %167, %152, %cst_58 {dimension_numbers = #tpu.dot_dimension_numbers<[2], [1], [1], [2], [0, 0, 0, 1, 1, 2], [0], [0]>} : vector<2x8x8xf32>, vector<2x8x64xf32>, vector<2x8x64xf32> -> vector<2x8x64xf32>
    "tpu.trace_stop"() : () -> ()
    %169 = vector.shape_cast %168 : vector<2x8x64xf32> to vector<16x64xf32>
    %170 = arith.truncf %169 : vector<16x64xf32> to vector<16x64xbf16>
    %171 = arith.index_cast %c1_i32 : i32 to index
    %c0_59 = arith.constant 0 : index
    %c0_60 = arith.constant 0 : index
    %172 = vector.load %arg4[%171, %c0_59, %c0_60] : memref<2x64x64xbf16, #tpu.memory_space<vmem>>, vector<1x64x64xbf16>
    %173 = vector.shape_cast %172 : vector<1x64x64xbf16> to vector<64x64xbf16>
    %cst_61 = arith.constant dense<0.000000e+00> : vector<16x64xf32>
    %174 = tpu.matmul %170, %173, %cst_61 {dimension_numbers = #tpu.dot_dimension_numbers<[1], [0], [0], [1], [0, 0, 1, 1], [], []>} : vector<16x64xbf16>, vector<64x64xbf16>, vector<16x64xf32> -> vector<16x64xf32>
    %175 = arith.index_cast %c1_i32 : i32 to index
    %c0_62 = arith.constant 0 : index
    %c0_63 = arith.constant 0 : index
    %176 = vector.load %arg5[%175, %c0_62, %c0_63] : memref<2x1x64xf32, #tpu.memory_space<vmem>>, vector<1x1x64xf32>
    %177 = vector.shape_cast %176 : vector<1x1x64xf32> to vector<1x64xf32>
    %178 = vector.broadcast %177 : vector<1x64xf32> to vector<16x64xf32>
    %179 = arith.addf %174, %178 : vector<16x64xf32>
    %180 = arith.addf %136, %179 : vector<16x64xf32>
    %181 = arith.index_cast %c1_i32 : i32 to index
    %c0_64 = arith.constant 0 : index
    %c0_65 = arith.constant 0 : index
    %182 = vector.load %arg6[%181, %c0_64, %c0_65] : memref<2x1x64xf32, #tpu.memory_space<vmem>>, vector<1x1x64xf32>
    %183 = vector.shape_cast %182 : vector<1x1x64xf32> to vector<1x64xf32>
    %184 = arith.index_cast %c1_i32 : i32 to index
    %c0_66 = arith.constant 0 : index
    %c0_67 = arith.constant 0 : index
    %185 = vector.load %arg7[%184, %c0_66, %c0_67] : memref<2x1x64xf32, #tpu.memory_space<vmem>>, vector<1x1x64xf32>
    %186 = vector.shape_cast %185 : vector<1x1x64xf32> to vector<1x64xf32>
    %cst_68 = arith.constant dense<0.000000e+00> : vector<16xf32>
    %187 = vector.multi_reduction <add>, %180, %cst_68 [1] : vector<16x64xf32> to vector<16xf32>
    %188 = vector.shape_cast %187 : vector<16xf32> to vector<16x1xf32>
    %cst_69 = arith.constant 6.400000e+01 : f32
    %189 = vector.broadcast %cst_69 : f32 to vector<16x1xf32>
    %190 = arith.divf %188, %189 : vector<16x1xf32>
    %191 = vector.broadcast %190 : vector<16x1xf32> to vector<16x64xf32>
    %192 = arith.subf %180, %191 : vector<16x64xf32>
    %193 = arith.mulf %192, %192 : vector<16x64xf32>
    %cst_70 = arith.constant dense<0.000000e+00> : vector<16xf32>
    %194 = vector.multi_reduction <add>, %193, %cst_70 [1] : vector<16x64xf32> to vector<16xf32>
    %195 = vector.shape_cast %194 : vector<16xf32> to vector<16x1xf32>
    %cst_71 = arith.constant 6.400000e+01 : f32
    %196 = vector.broadcast %cst_71 : f32 to vector<16x1xf32>
    %197 = arith.divf %195, %196 : vector<16x1xf32>
    %198 = vector.broadcast %190 : vector<16x1xf32> to vector<16x64xf32>
    %199 = arith.subf %180, %198 : vector<16x64xf32>
    %cst_72 = arith.constant 9.99999974E-6 : f32
    %200 = vector.broadcast %cst_72 : f32 to vector<16x1xf32>
    %201 = arith.addf %197, %200 : vector<16x1xf32>
    %202 = math.rsqrt %201 : vector<16x1xf32>
    %203 = vector.broadcast %202 : vector<16x1xf32> to vector<16x64xf32>
    %204 = arith.mulf %199, %203 : vector<16x64xf32>
    %205 = vector.broadcast %183 : vector<1x64xf32> to vector<16x64xf32>
    %206 = arith.mulf %204, %205 : vector<16x64xf32>
    %207 = vector.broadcast %186 : vector<1x64xf32> to vector<16x64xf32>
    %208 = arith.addf %206, %207 : vector<16x64xf32>
    %209 = arith.truncf %208 : vector<16x64xf32> to vector<16x64xbf16>
    %210 = arith.index_cast %c1_i32 : i32 to index
    %c0_73 = arith.constant 0 : index
    %c0_74 = arith.constant 0 : index
    %211 = vector.load %arg8[%210, %c0_73, %c0_74] : memref<2x64x128xbf16, #tpu.memory_space<vmem>>, vector<1x64x128xbf16>
    %212 = vector.shape_cast %211 : vector<1x64x128xbf16> to vector<64x128xbf16>
    %cst_75 = arith.constant dense<0.000000e+00> : vector<16x128xf32>
    %213 = tpu.matmul %209, %212, %cst_75 {dimension_numbers = #tpu.dot_dimension_numbers<[1], [0], [0], [1], [0, 0, 1, 1], [], []>} : vector<16x64xbf16>, vector<64x128xbf16>, vector<16x128xf32> -> vector<16x128xf32>
    %214 = arith.index_cast %c1_i32 : i32 to index
    %c0_76 = arith.constant 0 : index
    %c0_77 = arith.constant 0 : index
    %215 = vector.load %arg9[%214, %c0_76, %c0_77] : memref<2x1x128xf32, #tpu.memory_space<vmem>>, vector<1x1x128xf32>
    %216 = vector.shape_cast %215 : vector<1x1x128xf32> to vector<1x128xf32>
    %217 = vector.broadcast %216 : vector<1x128xf32> to vector<16x128xf32>
    %218 = arith.addf %213, %217 : vector<16x128xf32>
    %219 = arith.mulf %218, %218 : vector<16x128xf32>
    %220 = arith.mulf %218, %219 : vector<16x128xf32>
    %cst_78 = arith.constant 4.471500e-02 : f32
    %221 = vector.broadcast %cst_78 : f32 to vector<16x128xf32>
    %222 = arith.mulf %221, %220 : vector<16x128xf32>
    %223 = arith.addf %218, %222 : vector<16x128xf32>
    %cst_79 = arith.constant 0.797884583 : f32
    %224 = vector.broadcast %cst_79 : f32 to vector<16x128xf32>
    %225 = arith.mulf %224, %223 : vector<16x128xf32>
    %226 = math.tanh %225 : vector<16x128xf32>
    %cst_80 = arith.constant 1.000000e+00 : f32
    %227 = vector.broadcast %cst_80 : f32 to vector<16x128xf32>
    %228 = arith.addf %227, %226 : vector<16x128xf32>
    %cst_81 = arith.constant 5.000000e-01 : f32
    %229 = vector.broadcast %cst_81 : f32 to vector<16x128xf32>
    %230 = arith.mulf %229, %228 : vector<16x128xf32>
    %231 = arith.mulf %218, %230 : vector<16x128xf32>
    %232 = arith.truncf %231 : vector<16x128xf32> to vector<16x128xbf16>
    %233 = arith.index_cast %c1_i32 : i32 to index
    %c0_82 = arith.constant 0 : index
    %c0_83 = arith.constant 0 : index
    %234 = vector.load %arg10[%233, %c0_82, %c0_83] : memref<2x128x64xbf16, #tpu.memory_space<vmem>>, vector<1x128x64xbf16>
    %235 = vector.shape_cast %234 : vector<1x128x64xbf16> to vector<128x64xbf16>
    %cst_84 = arith.constant dense<0.000000e+00> : vector<16x64xf32>
    %236 = tpu.matmul %232, %235, %cst_84 {dimension_numbers = #tpu.dot_dimension_numbers<[1], [0], [0], [1], [0, 0, 1, 1], [], []>} : vector<16x128xbf16>, vector<128x64xbf16>, vector<16x64xf32> -> vector<16x64xf32>
    %237 = arith.index_cast %c1_i32 : i32 to index
    %c0_85 = arith.constant 0 : index
    %c0_86 = arith.constant 0 : index
    %238 = vector.load %arg11[%237, %c0_85, %c0_86] : memref<2x1x64xf32, #tpu.memory_space<vmem>>, vector<1x1x64xf32>
    %239 = vector.shape_cast %238 : vector<1x1x64xf32> to vector<1x64xf32>
    %240 = vector.broadcast %239 : vector<1x64xf32> to vector<16x64xf32>
    %241 = arith.addf %236, %240 : vector<16x64xf32>
    %242 = arith.addf %208, %241 : vector<16x64xf32>
    %243 = arith.index_cast %c1_i32 : i32 to index
    %c0_87 = arith.constant 0 : index
    %c0_88 = arith.constant 0 : index
    %244 = vector.load %arg12[%243, %c0_87, %c0_88] : memref<2x1x64xf32, #tpu.memory_space<vmem>>, vector<1x1x64xf32>
    %245 = vector.shape_cast %244 : vector<1x1x64xf32> to vector<1x64xf32>
    %246 = arith.index_cast %c1_i32 : i32 to index
    %c0_89 = arith.constant 0 : index
    %c0_90 = arith.constant 0 : index
    %247 = vector.load %arg13[%246, %c0_89, %c0_90] : memref<2x1x64xf32, #tpu.memory_space<vmem>>, vector<1x1x64xf32>
    %248 = vector.shape_cast %247 : vector<1x1x64xf32> to vector<1x64xf32>
    %cst_91 = arith.constant dense<0.000000e+00> : vector<16xf32>
    %249 = vector.multi_reduction <add>, %242, %cst_91 [1] : vector<16x64xf32> to vector<16xf32>
    %250 = vector.shape_cast %249 : vector<16xf32> to vector<16x1xf32>
    %cst_92 = arith.constant 6.400000e+01 : f32
    %251 = vector.broadcast %cst_92 : f32 to vector<16x1xf32>
    %252 = arith.divf %250, %251 : vector<16x1xf32>
    %253 = vector.broadcast %252 : vector<16x1xf32> to vector<16x64xf32>
    %254 = arith.subf %242, %253 : vector<16x64xf32>
    %255 = arith.mulf %254, %254 : vector<16x64xf32>
    %cst_93 = arith.constant dense<0.000000e+00> : vector<16xf32>
    %256 = vector.multi_reduction <add>, %255, %cst_93 [1] : vector<16x64xf32> to vector<16xf32>
    %257 = vector.shape_cast %256 : vector<16xf32> to vector<16x1xf32>
    %cst_94 = arith.constant 6.400000e+01 : f32
    %258 = vector.broadcast %cst_94 : f32 to vector<16x1xf32>
    %259 = arith.divf %257, %258 : vector<16x1xf32>
    %260 = vector.broadcast %252 : vector<16x1xf32> to vector<16x64xf32>
    %261 = arith.subf %242, %260 : vector<16x64xf32>
    %cst_95 = arith.constant 9.99999974E-6 : f32
    %262 = vector.broadcast %cst_95 : f32 to vector<16x1xf32>
    %263 = arith.addf %259, %262 : vector<16x1xf32>
    %264 = math.rsqrt %263 : vector<16x1xf32>
    %265 = vector.broadcast %264 : vector<16x1xf32> to vector<16x64xf32>
    %266 = arith.mulf %261, %265 : vector<16x64xf32>
    %267 = vector.broadcast %245 : vector<1x64xf32> to vector<16x64xf32>
    %268 = arith.mulf %266, %267 : vector<16x64xf32>
    %269 = vector.broadcast %248 : vector<1x64xf32> to vector<16x64xf32>
    %270 = arith.addf %268, %269 : vector<16x64xf32>
    %c2_i32 = arith.constant 2 : i32
    %271 = vector.shape_cast %270 : vector<16x64xf32> to vector<2x8x64xf32>
    %272 = vector.extract_strided_slice %271 {offsets = [0, 0, 0], sizes = [2, 1, 64], strides = [1, 1, 1]} : vector<2x8x64xf32> to vector<2x1x64xf32>
    %273 = vector.shape_cast %272 : vector<2x1x64xf32> to vector<2x64xf32>
    %274 = arith.truncf %273 : vector<2x64xf32> to vector<2x64xbf16>
    %c0_96 = arith.constant 0 : index
    %c0_97 = arith.constant 0 : index
    %275 = vector.load %arg14[%c0_96, %c0_97] : memref<64x128xbf16, #tpu.memory_space<vmem>>, vector<64x128xbf16>
    %cst_98 = arith.constant dense<0.000000e+00> : vector<2x128xf32>
    %276 = tpu.matmul %274, %275, %cst_98 {dimension_numbers = #tpu.dot_dimension_numbers<[1], [0], [0], [1], [0, 0, 1, 1], [], []>} : vector<2x64xbf16>, vector<64x128xbf16>, vector<2x128xf32> -> vector<2x128xf32>
    %c0_99 = arith.constant 0 : index
    %c0_100 = arith.constant 0 : index
    %277 = vector.load %arg15[%c0_99, %c0_100] : memref<1x128xf32, #tpu.memory_space<vmem>>, vector<1x128xf32>
    %278 = vector.broadcast %277 : vector<1x128xf32> to vector<2x128xf32>
    %279 = arith.addf %276, %278 : vector<2x128xf32>
    %c0_101 = arith.constant 0 : index
    %c0_102 = arith.constant 0 : index
    %280 = vector.load %arg16[%c0_101, %c0_102] : memref<2x128xf32, #tpu.memory_space<vmem>>, vector<2x128xf32>
    tpu.vector_store %arg16[%c0_101, %c0_102], %279 {strides = array<i32>} : memref<2x128xf32, #tpu.memory_space<vmem>>, vector<2x128xf32>,
    return
  }
}

</mosaic_0001>

<bundles_post_ra>
// kernel: roberta_forward.1
= control target key start
LH: loop header
LB: loop body
LE: loop exit
PB: predicated region body
PF: predicated region fallthrough
CT: control target
= control target key end

     0   :  { %s2117_s0 = inlined_call_operand.vmem [shape: f32[16,64], index: 0, kind: input, shape index: {}]   ;;  %s2118_s1 = inlined_call_operand.vmem [shape: f32[2,8], index: 1, kind: input, shape index: {}]   ;;  %s2119_s2 = inlined_call_operand.vmem [shape: bf16[2,64,192], index: 2, kind: input, shape index: {}]   ;;  %s2120_s3 = inlined_call_operand.vmem [shape: f32[2,1,192], index: 3, kind: input, shape index: {}]   ;;  %s2121_s4 = inlined_call_operand.vmem [shape: bf16[2,64,64], index: 4, kind: input, shape index: {}]   ;;  %s2122_s5 = inlined_call_operand.vmem [shape: f32[2,1,64], index: 5, kind: input, shape index: {}]   ;;  %s2123_s6 = inlined_call_operand.vmem [shape: f32[2,1,64], index: 6, kind: input, shape index: {}]   ;;  %s2124_s7 = inlined_call_operand.vmem [shape: f32[2,1,64], index: 7, kind: input, shape index: {}]   ;;  %s2125_s8 = inlined_call_operand.vmem [shape: bf16[2,64,128], index: 8, kind: input, shape index: {}]   ;;  %s2126_s9 = inlined_call_operand.vmem [shape: f32[2,1,128], index: 9, kind: input, shape index: {}]   ;;  %s2127_s10 = inlined_call_operand.vmem [shape: bf16[2,128,64], index: 10, kind: input, shape index: {}]   ;;  %s2128_s11 = inlined_call_operand.vmem [shape: f32[2,1,64], index: 11, kind: input, shape index: {}]   ;;  %s2129_s12 = inlined_call_operand.vmem [shape: f32[2,1,64], index: 12, kind: input, shape index: {}]   ;;  %s2130_s13 = inlined_call_operand.vmem [shape: f32[2,1,64], index: 13, kind: input, shape index: {}]   ;;  %s2131_s14 = inlined_call_operand.vmem [shape: bf16[64,128], index: 14, kind: input, shape index: {}]   ;;  %s2132_s15 = inlined_call_operand.vmem [shape: f32[1,128], index: 15, kind: input, shape index: {}]   ;;  %s2133_s16 = inlined_call_operand.hbm [shape: f32[2,128], index: 16, kind: output, shape index: {}]  }
   0x1   :  { %2135 = sst [smem:[#allocation5_spill]] %s2117_s0 }
   0x2   :  { %v1264_v0 = vld [vmem:[%s2119_s2 + $0x30] sm:$0xf]  ;;  %v1522_v1 = vld [vmem:[%s2119_s2 + $0x34] sm:$0xf0]  ;;  %v1256_v2 = vld [vmem:[%s2119_s2 + $0x20] sm:$0xf] }
   0x3   :  { %v1265_v3 = vor.u32 %v1522_v1, %v1264_v0  ;;  %v1520_v4 = vld [vmem:[%s2119_s2 + $0x24] sm:$0xf0]  ;;  %v1248_v6 = vld [vmem:[%s2119_s2 + $0x10] sm:$0xf]  ;;  %v1518_v7 = vld [vmem:[%s2119_s2 + $0x14] sm:$0xf0] }
   0x4   :  { %v1257_v5 = vor.u32 %v1520_v4, %v1256_v2  ;;  %v1240_v8 = vld [vmem:[%s2119_s2] sm:$0xf]  ;;  %v1516_v9 = vld [vmem:[%s2119_s2 + $0x4] sm:$0xf0]  ;;  %v1249_v10 = vor.u32 %v1518_v7, %v1248_v6 }
   0x5   :  { %123 = vmatpush.bf16.msra.mxu0 %v1265_v3 }
   0x9   :  { %124 = vmatpush.bf16.msra.mxu0 %v1257_v5 }
   0xa   :  { %21 = vsyncpa [#allocation3], 0  ;;  %v1241_v11 = vor.u32 %v1516_v9, %v1240_v8  ;;  %s2136_s24 = sld [smem:[#allocation5_spill]]  ;;  %vm115_vm0 = vcmask 523264   ;;  %v1781_v15 = vld [vmem:[%s2120_s3] sm:$0x3] }
   0xb   :  { %v71_v16 = vperm.slane %v1781_v15, 0  ;;  %s1653_s29 = smov 64   ;;  %v1521_v23 = vld [vmem:[%s2119_s2 + $0x34] sm:$0xf]  ;;  %v1266_v24 = vld [vmem:[%s2119_s2 + $0x38] sm:$0xf0] }
   0xc   :  { %v1519_v25 = vld [vmem:[%s2119_s2 + $0x24] sm:$0xf]  ;;  %v1269_v26 = vor.u32 %v1521_v23, %v1266_v24  ;;  %v1258_v27 = vld [vmem:[%s2119_s2 + $0x28] sm:$0xf0]  ;;  %v1517_v29 = vld [vmem:[%s2119_s2 + $0x14] sm:$0xf] }
   0xd   :  { %125 = vmatpush.bf16.msra.mxu0 %v1249_v10  ;;  %v1261_v28 = vor.u32 %v1519_v25, %v1258_v27  ;;  %v1250_v30 = vld [vmem:[%s2119_s2 + $0x18] sm:$0xf0]  ;;  %v1515_v32 = vld [vmem:[%s2119_s2 + $0x4] sm:$0xf]  ;;  %v1242_v33 = vld [vmem:[%s2119_s2 + $0x8] sm:$0xf0] }
   0xe   :  { %137 = vmatpush.bf16.msra.mxu1 %v1269_v26  ;;  %v1253_v31 = vor.u32 %v1517_v29, %v1250_v30  ;;  %v1245_v34 = vor.u32 %v1515_v32, %v1242_v33  ;;  %v1817_v35 = vld [vmem:[%s2118_s1] sm:$0x3]  ;;  %vm209_vm1 = vcmask 64512   ;;  %v72_v49 = vperm.slane %v1781_v15, 1  ;;  %v1526_v62 = vld [vmem:[%s2121_s4 + $0x18] sm:$0xff]  ;;  %v1525_v5 = vld [vmem:[%s2121_s4 + $0x10] sm:$0xff] }
   0xf   :  { %v203_v36 = vperm.slane %v1817_v35, 0  ;;  %v59_v40 = vrot.slane %v1817_v35, 1  ;;  %v1524_v6 = vld [vmem:[%s2121_s4 + $0x8] sm:$0xff]  ;;  %v1523_v7 = vld [vmem:[%s2121_s4] sm:$0xff]  ;;  %s1229_s28 = sshll.u32 %s2133_s16, 4  ;;  %s1230_s28 = int_to_ptr.hbm [resolvable:$true] %s1229_s28 }
  0x10   :  { %v1768_v12 = vld [vmem:[%s2136_s24] sm:$0xff]  ;;  %v1773_v13 = vld [vmem:[%s2136_s24 + $0x8] sm:$0xff] }
  0x11   :  { %v60_v14 = vpack.c.bf16 %v1773_v13, %v1768_v12  ;;  %126 = vmatpush.bf16.msra.mxu0 %v1241_v11  ;;  %v1825_v42 = vperm.slane %v59_v40, 0  ;;  %v1570_v11 = vld [vmem:[%s2122_s5] ss:$0 sm:$0xff]  ;;  %v1529_v40 = vld [vmem:[%s2125_s8 + $0x10] sm:$0xff] }
  0x12   :  { %138 = vmatpush.bf16.msra.mxu1 %v1261_v28 }
  0x14   :  { %1270 = vmatmul.msk.bf16.vlgmr.msra.gmra.mxu0 %vm115_vm0, %v60_v14 }
  0x16   :  { %139 = vmatpush.bf16.msra.mxu1 %v1253_v31 }
  0x1a   :  { %140 = vmatpush.bf16.msra.mxu1 %v1245_v34 }
  0x1d   :  { %1271 = vmatmul.msk.bf16.vlgmr.msra.gmra.mxu1 %vm115_vm0, %v60_v14 }
  0x91   :  { %v128_v17 = vpop.f32.mrf.mxu0 }
  0x92   :  { %v129_v18 = vadd.f32 %v128_v17, %v71_v16 }
  0x94   :  { %148 = vrot.lane.b32.xlu0 %v129_v18, %s1653_s29 }
  0x99   :  { %v130_v19 = vpop.f32.mrf.mxu0 }
  0x9a   :  { %v131_v20 = vadd.f32 %v130_v19, %v71_v16  ;;  %v142_v51 = vpop.f32.mrf.mxu1 }
  0x9b   :  { %v143_v52 = vadd.f32 %v142_v51, %v72_v49 }
  0x9c   :  { %175 = vrot.lane.b32.xlu0 %v131_v20, %s1653_s29 }
  0xa2   :  { %v144_v60 = vpop.f32.mrf.mxu1 }
  0xa3   :  { %v145_v61 = vadd.f32 %v144_v60, %v72_v49 }
  0xa5   :  { %273 = vmatpush.msra.mxu3 %v145_v61 }
 0x106   :  { %v149_v21 = vpop.permute.xlu0 %148 }
 0x107   :  { %1272 = vmatpush.xpose.msk.msra.mxu2 %vm115_vm0, %v149_v21 }
 0x10a   :  { %1273 = vmatmul.msk.f32.vlgmr.msra.gmra.mxu2 %vm115_vm0, %v129_v18 }
 0x10e   :  { %v176_v22 = vpop.permute.xlu0 %175 }
 0x10f   :  { %1274 = vmatpush.xpose.msk.msrb.mxu2 %vm115_vm0, %v176_v22  ;;  %v1654_v22 = vmov 64.0  }
 0x112   :  { %1275 = vmatmul.msk.f32.vlgmr.msrb.gmra.mxu2 %vm115_vm0, %v131_v20 }
 0x113   :  { %250 = vmatpush.msra.mxu2 %v143_v52 }
 0x115   :  { %322 = vmatpush.bf16.msrb.mxu2 %v1526_v62 }
 0x119   :  { %323 = vmatpush.bf16.msrb.mxu2 %v1525_v5 }
 0x11d   :  { %324 = vmatpush.bf16.msrb.mxu2 %v1524_v6 }
 0x121   :  { %325 = vmatpush.bf16.msrb.mxu2 %v1523_v7 }
 0x18d   :  { %v171_v37 = vpop.f32.mrf.mxu2 }
 0x18e   :  { %v201_v38 = vmul.f32 0.125, %v171_v37 }
 0x190   :  { %v207_v39 = vadd.f32 %v203_v36, %v201_v38 }
 0x192   :  { %v210_v41 = vsel %vm209_vm1, %v207_v39, -inf }
 0x193   :  { %211 = vmax.xlane.f32.xlu1 %v210_v41  ;;  %v1528_v41 = vld [vmem:[%s2125_s8 + $0x8] sm:$0xff] }
 0x195   :  { %v198_v43 = vpop.f32.mrf.mxu2 }
 0x196   :  { %v202_v44 = vmul.f32 0.125, %v198_v43 }
 0x198   :  { %v208_v45 = vadd.f32 %v1825_v42, %v202_v44  ;;  %v1527_v44 = vld [vmem:[%s2125_s8] sm:$0xff] }
 0x19a   :  { %v213_v46 = vsel %vm209_vm1, %v208_v45, -inf }
 0x19b   :  { %214 = vmax.xlane.f32.xlu1 %v213_v46 }
 0x206   :  { %v212_v47 = vpop.xlane.xlu1 %211 }
 0x207   :  { %v216_v48 = vsub.f32 %v207_v39, %v212_v47  ;;  %v1530_v39 = vld [vmem:[%s2125_s8 + $0x18] sm:$0xff] }
 0x208   :  { %441 = vmatpush.bf16.msrb.mxu3 %v1530_v39 }
 0x209   :  { %v218_v50 = vmul.f32 1.442695, %v216_v48 }
 0x20b   :  { %1585 = vpow2.f32 %v218_v50 }
 0x20c   :  { %442 = vmatpush.bf16.msrb.mxu3 %v1529_v40 }
 0x20e   :  { %v215_v53 = vpop.xlane.xlu1 %214 }
 0x20f   :  { %v217_v54 = vsub.f32 %v208_v45, %v215_v53 }
 0x210   :  { %443 = vmatpush.bf16.msrb.mxu3 %v1528_v41 }
 0x211   :  { %v1586_v55 = vpop.eup %1585  ;;  %v220_v56 = vmul.f32 1.442695, %v217_v54 }
 0x212   :  { %v222_v57 = vsel %vm209_vm1, %v1586_v55, 0.0 }
 0x213   :  { %1587 = vpow2.f32 %v220_v56  ;;  %223 = vadd.xlane.f32.xlu2 %v222_v57 }
 0x214   :  { %444 = vmatpush.bf16.msrb.mxu3 %v1527_v44 }
 0x219   :  { %v1588_v58 = vpop.eup %1587 }
 0x21a   :  { %v225_v59 = vsel %vm209_vm1, %v1588_v58, 0.0 }
 0x21b   :  { %226 = vadd.xlane.f32.xlu2 %v225_v59 }
 0x286   :  { %v224_v63 = vpop.xlane.xlu2 %223 }
 0x287   :  { %1589 = vrcp.f32 %v224_v63  ;;  %v1571_v63 = vld [vmem:[%s2123_s6] ss:$0 sm:$0xff] }
 0x28d   :  { %v1590_v0 = vpop.eup %1589 }
 0x28e   :  { %v230_v1 = vmul.f32 %v1590_v0, %v1586_v55  ;;  %v227_v2 = vpop.xlane.xlu2 %226 }
 0x28f   :  { %1591 = vrcp.f32 %v227_v2 }
 0x290   :  { %1276 = vmatmul.msk.f32.vlgmr.msra.gmra.mxu2 %vm209_vm1, %v230_v1  ;;  %1593 = vrcp.f32 %v1654_v22 }
 0x295   :  { %v1592_v3 = vpop.eup %1591 }
 0x296   :  { %v231_v4 = vmul.f32 %v1592_v3, %v1588_v58  ;;  %v1594_v23 = vpop.eup %1593 }
 0x297   :  { %v343_v24 = vmul.f32 64.0, %v1594_v23  ;;  %vm347_vm2 = vweird.f32 %v1594_v23 }
 0x298   :  { %1277 = vmatmul.msk.f32.vlgmr.msra.gmra.mxu3 %vm209_vm1, %v231_v4  ;;  %v1572_v4 = vld [vmem:[%s2124_s7] ss:$0 sm:$0xff] }
 0x299   :  { %v344_v25 = vsub.f32 1.0, %v343_v24 }
 0x29b   :  { %v345_v26 = vmul.f32 %v1594_v23, %v344_v25 }
 0x29d   :  { %v346_v27 = vadd.f32 %v1594_v23, %v345_v26 }
 0x29f   :  { %v1854_v28 = vsel %vm347_vm2, %v1594_v23, %v346_v27 }
 0x313   :  { %v252_v8 = vpop.f32.mrf.mxu2 }
 0x31b   :  { %v275_v9 = vpop.f32.mrf.mxu3 }
 0x31c   :  { %v278_v10 = vpack.c.bf16 %v275_v9, %v252_v8  ;;  %v1538_v9 = vld [vmem:[%s2127_s10 + $0x38] sm:$0xff] }
 0x31d   :  { %538 = vmatpush.bf16.msrb.mxu0 %v1538_v9 }
 0x31e   :  { %1294 = vmatmul.msk.bf16.vlgmr.msrb.gmra.mxu2 %vm115_vm0, %v278_v10  ;;  %v1537_v10 = vld [vmem:[%s2127_s10 + $0x30] sm:$0xff] }
 0x321   :  { %539 = vmatpush.bf16.msrb.mxu0 %v1537_v10  ;;  %v1373_v10 = vld [vmem:[%s2119_s2 + $0x68] sm:$0xf0] }
 0x3a1   :  { %v327_v14 = vpop.f32.mrf.mxu2 }
 0x3a2   :  { %v328_v15 = vadd.f32 %v1570_v11, %v327_v14  ;;  %v1535_v14 = vld [vmem:[%s2127_s10 + $0x20] sm:$0xff] }
 0x3a4   :  { %v332_v16 = vadd.f32 %v328_v15, %v1768_v12  ;;  %v1534_v15 = vld [vmem:[%s2127_s10 + $0x18] sm:$0xff] }
 0x3a6   :  { %v336_v17 = vsel %vm115_vm0, %v332_v16, 0.0 }
 0x3a7   :  { %337 = vadd.xlane.f32.xlu0 %v336_v17  ;;  %v1532_v17 = vld [vmem:[%s2127_s10 + $0x8] sm:$0xff] }
 0x3a9   :  { %v329_v18 = vpop.f32.mrf.mxu2 }
 0x3aa   :  { %v330_v19 = vadd.f32 %v1570_v11, %v329_v18  ;;  %v1536_v11 = vld [vmem:[%s2127_s10 + $0x28] sm:$0xff]  ;;  %v1573_v18 = vld [vmem:[%s2126_s9] ss:$0 sm:$0xff] }
 0x3ab   :  { %540 = vmatpush.bf16.msrb.mxu0 %v1536_v11 }
 0x3ac   :  { %v333_v20 = vadd.f32 %v330_v19, %v1773_v13  ;;  %v1531_v19 = vld [vmem:[%s2127_s10] sm:$0xff] }
 0x3ae   :  { %v339_v21 = vsel %vm115_vm0, %v333_v20, 0.0 }
 0x3af   :  { %340 = vadd.xlane.f32.xlu1 %v339_v21  ;;  %541 = vmatpush.bf16.msrb.mxu0 %v1535_v14  ;;  %v1363_v14 = vld [vmem:[%s2119_s2 + $0x50] sm:$0xf] }
 0x3b3   :  { %542 = vmatpush.bf16.msrb.mxu0 %v1534_v15  ;;  %v1542_v15 = vld [vmem:[%s2119_s2 + $0x54] sm:$0xf0] }
 0x41a   :  { %v338_v12 = vpop.xlane.xlu0 %337 }
 0x41b   :  { %v349_v29 = vmul.f32 %v1854_v28, %v338_v12 }
 0x41d   :  { %v351_v30 = vsub.f32 %v332_v16, %v349_v29  ;;  %v1533_v16 = vld [vmem:[%s2127_s10 + $0x10] sm:$0xff] }
 0x41e   :  { %543 = vmatpush.bf16.msrb.mxu0 %v1533_v16  ;;  %v1541_v16 = vld [vmem:[%s2119_s2 + $0x54] sm:$0xf] }
 0x41f   :  { %v353_v31 = vmul.f32 %v351_v30, %v351_v30 }
 0x421   :  { %v355_v13 = vsel %vm115_vm0, %v353_v31, 0.0 }
 0x422   :  { %v341_v32 = vpop.xlane.xlu1 %340  ;;  %356 = vadd.xlane.f32.xlu2 %v355_v13  ;;  %544 = vmatpush.bf16.msrb.mxu0 %v1532_v17  ;;  %v1364_v17 = vor.u32 %v1542_v15, %v1363_v14 }
 0x423   :  { %v350_v33 = vmul.f32 %v1854_v28, %v341_v32 }
 0x425   :  { %v352_v34 = vsub.f32 %v333_v20, %v350_v33 }
 0x426   :  { %545 = vmatpush.bf16.msrb.mxu0 %v1531_v19 }
 0x427   :  { %v354_v37 = vmul.f32 %v352_v34, %v352_v34 }
 0x429   :  { %v358_v38 = vsel %vm115_vm0, %v354_v37, 0.0 }
 0x42a   :  { %359 = vadd.xlane.f32.xlu1 %v358_v38 }
 0x495   :  { %v357_v43 = vpop.xlane.xlu2 %356 }
 0x496   :  { %v361_v45 = vmul.f32 %v357_v43, %v1854_v28 }
 0x498   :  { %v363_v46 = vadd.f32 1e-05, %v361_v45  ;;  %v1574_v45 = vld [vmem:[%s2128_s11] ss:$0 sm:$0xff] }
 0x49a   :  { %1595 = vrsqrt.f32 %v363_v46  ;;  %vm371_vm4 = vweird.f32 %v363_v46 }
 0x49d   :  { %v360_v47 = vpop.xlane.xlu1 %359 }
 0x49e   :  { %v362_v48 = vmul.f32 %v360_v47, %v1854_v28 }
 0x4a0   :  { %v1596_v49 = vpop.eup %1595  ;;  %v364_v50 = vadd.f32 1e-05, %v362_v48 }
 0x4a1   :  { %v366_v51 = vmul.f32 %v1596_v49, %v363_v46  ;;  %vm372_vm3 = vweird.f32 %v1596_v49 }
 0x4a2   :  { %1597 = vrsqrt.f32 %v364_v50  ;;  %vm373_vm5 = vmor %vm371_vm4, %vm372_vm3  ;;  %vm381_vm7 = vweird.f32 %v364_v50 }
 0x4a3   :  { %v367_v52 = vmul.f32 %v1596_v49, %v366_v51 }
 0x4a5   :  { %v368_v53 = vmul.f32 0.5, %v367_v52 }
 0x4a7   :  { %v369_v54 = vsub.f32 1.5, %v368_v53 }
 0x4a8   :  { %v1598_v55 = vpop.eup %1597 }
 0x4a9   :  { %v370_v56 = vmul.f32 %v1596_v49, %v369_v54  ;;  %v376_v57 = vmul.f32 %v1598_v55, %v364_v50  ;;  %vm382_vm6 = vweird.f32 %v1598_v55 }
 0x4aa   :  { %vm383_vm8 = vmor %vm381_vm7, %vm382_vm6 }
 0x4ab   :  { %v377_v58 = vmul.f32 %v1598_v55, %v376_v57  ;;  %v374_v59 = vsel %vm373_vm5, %v1596_v49, %v370_v56 }
 0x4ac   :  { %v385_v62 = vmul.f32 %v374_v59, %v351_v30 }
 0x4ad   :  { %v378_v60 = vmul.f32 0.5, %v377_v58 }
 0x4ae   :  { %v390_v3 = vmul.f32 %v1571_v63, %v385_v62 }
 0x4af   :  { %v379_v61 = vsub.f32 1.5, %v378_v60 }
 0x4b0   :  { %v395_v6 = vadd.f32 %v1572_v4, %v390_v3 }
 0x4b1   :  { %v380_v0 = vmul.f32 %v1598_v55, %v379_v61 }
 0x4b3   :  { %v384_v1 = vsel %vm383_vm8, %v1598_v55, %v380_v0  ;;  %v1379_v0 = vld [vmem:[%s2119_s2 + $0x70] sm:$0xf] }
 0x4b4   :  { %v386_v2 = vmul.f32 %v384_v1, %v352_v34  ;;  %v1546_v1 = vld [vmem:[%s2119_s2 + $0x74] sm:$0xf0] }
 0x4b5   :  { %v1380_v3 = vor.u32 %v1546_v1, %v1379_v0 }
 0x4b6   :  { %v391_v5 = vmul.f32 %v1571_v63, %v386_v2  ;;  %v1545_v2 = vld [vmem:[%s2119_s2 + $0x74] sm:$0xf] }
 0x4b7   :  { %674 = vmatpush.bf16.msrb.mxu1 %v1380_v3 }
 0x4b8   :  { %v396_v7 = vadd.f32 %v1572_v4, %v391_v5  ;;  %v1381_v4 = vld [vmem:[%s2119_s2 + $0x78] sm:$0xf0] }
 0x4b9   :  { %v1384_v5 = vor.u32 %v1545_v2, %v1381_v4 }
 0x4ba   :  { %v397_v8 = vpack.c.bf16 %v396_v7, %v395_v6 }
 0x4bb   :  { %688 = vmatpush.bf16.msra.mxu2 %v1384_v5 }
 0x4bc   :  { %1311 = vmatmul.msk.bf16.vlgmr.msrb.gmra.mxu3 %vm115_vm0, %v397_v8  ;;  %v1543_v8 = vld [vmem:[%s2119_s2 + $0x64] sm:$0xf] }
 0x4bd   :  { %v1376_v11 = vor.u32 %v1543_v8, %v1373_v10 }
 0x4bf   :  { %689 = vmatpush.bf16.msra.mxu2 %v1376_v11 }
 0x53f   :  { %v446_v20 = vpop.f32.mrf.mxu3 }
 0x540   :  { %v447_v21 = vadd.f32 %v1573_v18, %v446_v20  ;;  %v1355_v20 = vld [vmem:[%s2119_s2 + $0x40] sm:$0xf] }
 0x542   :  { %v451_v22 = vmul.f32 %v447_v21, %v447_v21 }
 0x544   :  { %v453_v23 = vmul.f32 %v451_v22, %v447_v21  ;;  %v1539_v22 = vld [vmem:[%s2119_s2 + $0x44] sm:$0xf] }
 0x546   :  { %v455_v24 = vmul.f32 0.044715, %v453_v23 }
 0x547   :  { %v448_v25 = vpop.f32.mrf.mxu3 }
 0x548   :  { %v457_v26 = vadd.f32 %v455_v24, %v447_v21  ;;  %v449_v27 = vadd.f32 %v1573_v18, %v448_v25  ;;  %v1365_v18 = vld [vmem:[%s2119_s2 + $0x58] sm:$0xf0]  ;;  %v1357_v25 = vld [vmem:[%s2119_s2 + $0x48] sm:$0xf0] }
 0x549   :  { %v1368_v19 = vor.u32 %v1541_v16, %v1365_v18 }
 0x54a   :  { %v459_v12 = vmul.f32 0.7978846, %v457_v26  ;;  %v452_v29 = vmul.f32 %v449_v27, %v449_v27 }
 0x54b   :  { %690 = vmatpush.bf16.msra.mxu2 %v1368_v19 }
 0x54c   :  { %v454_v30 = vmul.f32 %v452_v29, %v449_v27  ;;  %1599 = vtanh.f32 %v459_v12 }
 0x54e   :  { %v456_v31 = vmul.f32 0.044715, %v454_v30 }
 0x550   :  { %v458_v13 = vadd.f32 %v456_v31, %v449_v27 }
 0x552   :  { %v460_v32 = vmul.f32 0.7978846, %v458_v13  ;;  %v1600_v33 = vpop.eup %1599 }
 0x553   :  { %v463_v34 = vadd.f32 1.0, %v1600_v33 }
 0x554   :  { %1601 = vtanh.f32 %v460_v32 }
 0x555   :  { %v465_v39 = vmul.f32 0.5, %v463_v34 }
 0x557   :  { %v467_v41 = vmul.f32 %v465_v39, %v447_v21  ;;  %v1540_v21 = vld [vmem:[%s2119_s2 + $0x44] sm:$0xf0] }
 0x558   :  { %v1356_v24 = vor.u32 %v1540_v21, %v1355_v20 }
 0x55a   :  { %v1602_v37 = vpop.eup %1601 }
 0x55b   :  { %v464_v38 = vadd.f32 1.0, %v1602_v37 }
 0x55d   :  { %v466_v40 = vmul.f32 0.5, %v464_v38 }
 0x55f   :  { %v468_v43 = vmul.f32 %v466_v40, %v449_v27  ;;  %v1360_v27 = vor.u32 %v1539_v22, %v1357_v25 }
 0x561   :  { %v469_v44 = vpack.c.bf16 %v468_v43, %v467_v41  ;;  %691 = vmatpush.bf16.msra.mxu2 %v1360_v27 }
 0x563   :  { %546 = vmatmul.bf16.vlgmr.msrb.gmra.mxu0 %v469_v44 }
 0x5e0   :  { %v547_v46 = vpop.f32.mrf.mxu0 }
 0x5e1   :  { %v548_v47 = vadd.f32 %v1574_v45, %v547_v46 }
 0x5e3   :  { %v552_v48 = vadd.f32 %v548_v47, %v395_v6  ;;  %v1371_v6 = vld [vmem:[%s2119_s2 + $0x60] sm:$0xf] }
 0x5e4   :  { %v1575_v47 = vld [vmem:[%s2129_s12] ss:$0 sm:$0xff] }
 0x5e5   :  { %v556_v49 = vsel %vm115_vm0, %v552_v48, 0.0 }
 0x5e6   :  { %557 = vadd.xlane.f32.xlu2 %v556_v49 }
 0x5e8   :  { %v549_v50 = vpop.f32.mrf.mxu0 }
 0x5e9   :  { %v550_v51 = vadd.f32 %v1574_v45, %v549_v50 }
 0x5eb   :  { %v553_v52 = vadd.f32 %v550_v51, %v396_v7  ;;  %v1544_v7 = vld [vmem:[%s2119_s2 + $0x64] sm:$0xf0] }
 0x5ec   :  { %v1372_v9 = vor.u32 %v1544_v7, %v1371_v6 }
 0x5ed   :  { %v559_v53 = vsel %vm115_vm0, %v553_v52, 0.0 }
 0x5ee   :  { %560 = vadd.xlane.f32.xlu1 %v559_v53  ;;  %675 = vmatpush.bf16.msrb.mxu1 %v1372_v9 }
 0x5f2   :  { %676 = vmatpush.bf16.msrb.mxu1 %v1364_v17 }
 0x5f6   :  { %677 = vmatpush.bf16.msrb.mxu1 %v1356_v24 }
 0x659   :  { %v558_v54 = vpop.xlane.xlu2 %557 }
 0x65a   :  { %v562_v55 = vmul.f32 %v558_v54, %v1854_v28 }
 0x65c   :  { %v1914_v56 = vsub.f32 %v552_v48, %v562_v55 }
 0x65e   :  { %v566_v57 = vmul.f32 %v1914_v56, %v1914_v56 }
 0x660   :  { %v568_v58 = vsel %vm115_vm0, %v566_v57, 0.0  ;;  %v1352_v57 = vld [vmem:[%s2120_s3 + $0x2] sm:$0x3] }
 0x661   :  { %v561_v59 = vpop.xlane.xlu1 %560  ;;  %569 = vadd.xlane.f32.xlu2 %v568_v58  ;;  %v623_v58 = vperm.slane %v1352_v57, 0 }
 0x662   :  { %v563_v60 = vmul.f32 %v561_v59, %v1854_v28 }
 0x664   :  { %v1920_v61 = vsub.f32 %v553_v52, %v563_v60  ;;  %v1576_v52 = vld [vmem:[%s2130_s13] ss:$0 sm:$0xff] }
 0x666   :  { %v567_v62 = vmul.f32 %v1920_v61, %v1920_v61 }
 0x668   :  { %v571_v63 = vsel %vm115_vm0, %v567_v62, 0.0 }
 0x669   :  { %572 = vadd.xlane.f32.xlu1 %v571_v63  ;;  %v624_v63 = vperm.slane %v1352_v57, 1 }
 0x6d4   :  { %v570_v23 = vpop.xlane.xlu2 %569 }
 0x6d5   :  { %v574_v26 = vmul.f32 %v570_v23, %v1854_v28 }
 0x6d7   :  { %v576_v12 = vadd.f32 1e-05, %v574_v26 }
 0x6d9   :  { %1603 = vrsqrt.f32 %v576_v12  ;;  %vm584_vm10 = vweird.f32 %v576_v12 }
 0x6dc   :  { %v573_v29 = vpop.xlane.xlu1 %572 }
 0x6dd   :  { %v575_v30 = vmul.f32 %v573_v29, %v1854_v28  ;;  %v1550_v29 = vld [vmem:[%s2121_s4 + $0x38] sm:$0xff] }
 0x6de   :  { %870 = vmatpush.bf16.msrb.mxu2 %v1550_v29  ;;  %v1558_v29 = vld [vmem:[%s2127_s10 + $0x58] sm:$0xff] }
 0x6df   :  { %v1604_v31 = vpop.eup %1603  ;;  %v577_v13 = vadd.f32 1e-05, %v575_v30  ;;  %v1549_v30 = vld [vmem:[%s2121_s4 + $0x30] sm:$0xff] }
 0x6e0   :  { %v579_v32 = vmul.f32 %v1604_v31, %v576_v12  ;;  %vm585_vm9 = vweird.f32 %v1604_v31 }
 0x6e1   :  { %1605 = vrsqrt.f32 %v577_v13  ;;  %vm586_vm11 = vmor %vm584_vm10, %vm585_vm9  ;;  %vm594_vm13 = vweird.f32 %v577_v13 }
 0x6e2   :  { %v580_v33 = vmul.f32 %v1604_v31, %v579_v32  ;;  %871 = vmatpush.bf16.msrb.mxu2 %v1549_v30  ;;  %v1557_v30 = vld [vmem:[%s2127_s10 + $0x50] sm:$0xff] }
 0x6e4   :  { %v581_v34 = vmul.f32 0.5, %v580_v33 }
 0x6e6   :  { %v582_v37 = vsub.f32 1.5, %v581_v34 }
 0x6e7   :  { %v1606_v38 = vpop.eup %1605 }
 0x6e8   :  { %v583_v39 = vmul.f32 %v1604_v31, %v582_v37  ;;  %v589_v40 = vmul.f32 %v1606_v38, %v577_v13  ;;  %vm595_vm12 = vweird.f32 %v1606_v38  ;;  %v1547_v13 = vld [vmem:[%s2121_s4 + $0x20] sm:$0xff] }
 0x6e9   :  { %vm596_vm14 = vmor %vm594_vm13, %vm595_vm12  ;;  %v1577_v37 = vld [vmem:[%s2122_s5 + $0x1] ss:$0 sm:$0xff]  ;;  %vm1178_vm12 = vcmask 1041409  }
 0x6ea   :  { %v590_v41 = vmul.f32 %v1606_v38, %v589_v40  ;;  %v587_v43 = vsel %vm586_vm11, %v1604_v31, %v583_v39  ;;  %v1548_v31 = vld [vmem:[%s2121_s4 + $0x28] sm:$0xff] }
 0x6eb   :  { %v598_v46 = vmul.f32 %v587_v43, %v1914_v56  ;;  %872 = vmatpush.bf16.msrb.mxu2 %v1548_v31  ;;  %v1556_v31 = vld [vmem:[%s2127_s10 + $0x48] sm:$0xff] }
 0x6ec   :  { %v591_v44 = vmul.f32 0.5, %v590_v41 }
 0x6ed   :  { %v603_v51 = vmul.f32 %v1575_v47, %v598_v46 }
 0x6ee   :  { %v592_v45 = vsub.f32 1.5, %v591_v44 }
 0x6ef   :  { %v1983_v54 = vadd.f32 %v1576_v52, %v603_v51  ;;  %873 = vmatpush.bf16.msrb.mxu2 %v1547_v13  ;;  %v1580_v13 = vld [vmem:[%s2126_s9 + $0x1] ss:$0 sm:$0xff] }
 0x6f0   :  { %v593_v48 = vmul.f32 %v1606_v38, %v592_v45 }
 0x6f2   :  { %v597_v49 = vsel %vm596_vm14, %v1606_v38, %v593_v48 }
 0x6f3   :  { %v599_v50 = vmul.f32 %v597_v49, %v1920_v61 }
 0x6f5   :  { %v604_v53 = vmul.f32 %v1575_v47, %v599_v50 }
 0x6f7   :  { %v1985_v55 = vadd.f32 %v1576_v52, %v604_v53 }
 0x6f9   :  { %v610_v56 = vpack.c.bf16 %v1985_v55, %v1983_v54 }
 0x6fb   :  { %1385 = vmatmul.msk.bf16.vlgmr.msrb.gmra.mxu1 %vm115_vm0, %v610_v56  ;;  %1386 = vmatmul.msk.bf16.vlgmr.msra.gmra.mxu2 %vm115_vm0, %v610_v56 }
 0x778   :  { %v679_v59 = vpop.f32.mrf.mxu1 }
 0x779   :  { %v680_v60 = vadd.f32 %v679_v59, %v623_v58  ;;  %v1552_v59 = vld [vmem:[%s2125_s8 + $0x28] sm:$0xff] }
 0x77b   :  { %699 = vrot.lane.b32.xlu2 %v680_v60, %s1653_s29 }
 0x77e   :  { %v693_v0 = vpop.f32.mrf.mxu2 }
 0x77f   :  { %v694_v1 = vadd.f32 %v693_v0, %v624_v63 }
 0x780   :  { %v681_v61 = vpop.f32.mrf.mxu1 }
 0x781   :  { %v682_v62 = vadd.f32 %v681_v61, %v623_v58  ;;  %v1553_v58 = vld [vmem:[%s2125_s8 + $0x30] sm:$0xff] }
 0x783   :  { %726 = vrot.lane.b32.xlu1 %v682_v62, %s1653_s29 }
 0x786   :  { %v695_v3 = vpop.f32.mrf.mxu2 }
 0x787   :  { %v696_v4 = vadd.f32 %v695_v3, %v624_v63 }
 0x7d5   :  { %v700_v2 = vpop.permute.xlu2 %699 }
 0x7d6   :  { %1387 = vmatpush.xpose.msk.msra.mxu3 %vm115_vm0, %v700_v2 }
 0x7d9   :  { %1388 = vmatmul.msk.f32.vlgmr.msra.gmra.mxu3 %vm115_vm0, %v680_v60 }
 0x7da   :  { %796 = vmatpush.msrb.mxu3 %v694_v1 }
 0x7f5   :  { %v727_v5 = vpop.permute.xlu1 %726 }
 0x7f6   :  { %1389 = vmatpush.xpose.msk.msra.mxu1 %vm115_vm0, %v727_v5 }
 0x7f9   :  { %1390 = vmatmul.msk.f32.vlgmr.msra.gmra.mxu1 %vm115_vm0, %v682_v62  ;;  %v1551_v62 = vld [vmem:[%s2125_s8 + $0x20] sm:$0xff] }
 0x7fa   :  { %819 = vmatpush.msrb.mxu1 %v696_v4 }
 0x85c   :  { %v722_v6 = vpop.f32.mrf.mxu3 }
 0x85d   :  { %v752_v7 = vmul.f32 0.125, %v722_v6 }
 0x85f   :  { %v754_v8 = vadd.f32 %v752_v7, %v203_v36 }
 0x861   :  { %v756_v9 = vsel %vm209_vm1, %v754_v8, -inf }
 0x862   :  { %757 = vmax.xlane.f32.xlu0 %v756_v9 }
 0x876   :  { %v749_v10 = vpop.f32.mrf.mxu1 }
 0x877   :  { %v753_v11 = vmul.f32 0.125, %v749_v10 }
 0x879   :  { %v755_v14 = vadd.f32 %v753_v11, %v1825_v42 }
 0x87b   :  { %v759_v15 = vsel %vm209_vm1, %v755_v14, -inf }
 0x87c   :  { %760 = vmax.xlane.f32.xlu2 %v759_v15 }
 0x8d5   :  { %v758_v16 = vpop.xlane.xlu0 %757 }
 0x8d6   :  { %v762_v17 = vsub.f32 %v754_v8, %v758_v16 }
 0x8d8   :  { %v764_v18 = vmul.f32 1.442695, %v762_v17  ;;  %v1578_v17 = vld [vmem:[%s2123_s6 + $0x1] ss:$0 sm:$0xff] }
 0x8da   :  { %1607 = vpow2.f32 %v764_v18 }
 0x8e0   :  { %v1608_v19 = vpop.eup %1607 }
 0x8e1   :  { %v768_v20 = vsel %vm209_vm1, %v1608_v19, 0.0 }
 0x8e2   :  { %769 = vadd.xlane.f32.xlu0 %v768_v20 }
 0x8ef   :  { %v761_v35 = vpop.xlane.xlu2 %760 }
 0x8f0   :  { %v763_v36 = vsub.f32 %v755_v14, %v761_v35  ;;  %v1579_v35 = vld [vmem:[%s2124_s7 + $0x1] ss:$0 sm:$0xff] }
 0x8f2   :  { %v766_v21 = vmul.f32 1.442695, %v763_v36 }
 0x8f4   :  { %1609 = vpow2.f32 %v766_v21 }
 0x8fa   :  { %v1610_v22 = vpop.eup %1609 }
 0x8fb   :  { %v771_v23 = vsel %vm209_vm1, %v1610_v22, 0.0 }
 0x8fc   :  { %772 = vadd.xlane.f32.xlu1 %v771_v23 }
 0x955   :  { %v770_v42 = vpop.xlane.xlu0 %769 }
 0x956   :  { %1611 = vrcp.f32 %v770_v42 }
 0x95c   :  { %v1612_v24 = vpop.eup %1611 }
 0x95d   :  { %v776_v25 = vmul.f32 %v1612_v24, %v1608_v19 }
 0x95f   :  { %1391 = vmatmul.msk.f32.vlgmr.msrb.gmra.mxu3 %vm209_vm1, %v776_v25  ;;  %v1562_v25 = vld [vmem:[%s2127_s10 + $0x78] sm:$0xff] }
 0x960   :  { %1085 = vmatpush.bf16.msra.mxu3 %v1562_v25 }
 0x96f   :  { %v773_v26 = vpop.xlane.xlu1 %772 }
 0x970   :  { %1613 = vrcp.f32 %v773_v26  ;;  %v1561_v26 = vld [vmem:[%s2127_s10 + $0x70] sm:$0xff] }
 0x971   :  { %1086 = vmatpush.bf16.msra.mxu3 %v1561_v26 }
 0x976   :  { %v1614_v27 = vpop.eup %1613 }
 0x977   :  { %v777_v12 = vmul.f32 %v1614_v27, %v1610_v22  ;;  %v1560_v27 = vld [vmem:[%s2127_s10 + $0x68] sm:$0xff] }
 0x978   :  { %1087 = vmatpush.bf16.msra.mxu3 %v1560_v27 }
 0x979   :  { %1392 = vmatmul.msk.f32.vlgmr.msrb.gmra.mxu1 %vm209_vm1, %v777_v12  ;;  %v1559_v12 = vld [vmem:[%s2127_s10 + $0x60] sm:$0xff] }
 0x97c   :  { %1088 = vmatpush.bf16.msra.mxu3 %v1559_v12 }
 0x980   :  { %1089 = vmatpush.bf16.msra.mxu3 %v1558_v29 }
 0x984   :  { %1090 = vmatpush.bf16.msra.mxu3 %v1557_v30 }
 0x988   :  { %1091 = vmatpush.bf16.msra.mxu3 %v1556_v31 }
 0x9e2   :  { %v798_v32 = vpop.f32.mrf.mxu3 }
 0x9f6   :  { %v821_v33 = vpop.f32.mrf.mxu1 }
 0x9f7   :  { %v824_v34 = vpack.c.bf16 %v821_v33, %v798_v32  ;;  %v1555_v32 = vld [vmem:[%s2127_s10 + $0x40] sm:$0xff] }
 0x9f8   :  { %1092 = vmatpush.bf16.msra.mxu3 %v1555_v32  ;;  %v1582_v32 = vld [vmem:[%s2129_s12 + $0x1] ss:$0 sm:$0xff] }
 0x9f9   :  { %1418 = vmatmul.msk.bf16.vlgmr.msrb.gmra.mxu2 %vm115_vm0, %v824_v34 }
 0xa7c   :  { %v875_v38 = vpop.f32.mrf.mxu2 }
 0xa7d   :  { %v876_v39 = vadd.f32 %v1577_v37, %v875_v38 }
 0xa7f   :  { %v880_v40 = vadd.f32 %v876_v39, %v1983_v54 }
 0xa81   :  { %v886_v41 = vsel %vm115_vm0, %v880_v40, 0.0 }
 0xa82   :  { %887 = vadd.xlane.f32.xlu0 %v886_v41 }
 0xa84   :  { %v877_v43 = vpop.f32.mrf.mxu2 }
 0xa85   :  { %v878_v44 = vadd.f32 %v1577_v37, %v877_v43 }
 0xa87   :  { %v881_v45 = vadd.f32 %v878_v44, %v1985_v55  ;;  %v1554_v55 = vld [vmem:[%s2125_s8 + $0x38] sm:$0xff] }
 0xa88   :  { %986 = vmatpush.bf16.msra.mxu0 %v1554_v55 }
 0xa89   :  { %v889_v46 = vsel %vm115_vm0, %v881_v45, 0.0 }
 0xa8a   :  { %890 = vadd.xlane.f32.xlu0 %v889_v46 }
 0xa8c   :  { %987 = vmatpush.bf16.msra.mxu0 %v1553_v58 }
 0xa90   :  { %988 = vmatpush.bf16.msra.mxu0 %v1552_v59  ;;  %v1581_v59 = vld [vmem:[%s2128_s11 + $0x1] ss:$0 sm:$0xff] }
 0xa94   :  { %989 = vmatpush.bf16.msra.mxu0 %v1551_v62 }
 0xaf5   :  { %v888_v47 = vpop.xlane.xlu0 %887 }
 0xaf6   :  { %v892_v48 = vmul.f32 %v888_v47, %v1854_v28 }
 0xaf8   :  { %v894_v49 = vsub.f32 %v880_v40, %v892_v48 }
 0xafa   :  { %v896_v50 = vmul.f32 %v894_v49, %v894_v49 }
 0xafc   :  { %v898_v51 = vsel %vm115_vm0, %v896_v50, 0.0 }
 0xafd   :  { %899 = vadd.xlane.f32.xlu0 %v898_v51  ;;  %v891_v52 = vpop.xlane.xlu0 %890 }
 0xafe   :  { %v893_v53 = vmul.f32 %v891_v52, %v1854_v28 }
 0xb00   :  { %v895_v54 = vsub.f32 %v881_v45, %v893_v53 }
 0xb02   :  { %v897_v56 = vmul.f32 %v895_v54, %v895_v54 }
 0xb04   :  { %v901_v57 = vsel %vm115_vm0, %v897_v56, 0.0 }
 0xb05   :  { %902 = vadd.xlane.f32.xlu0 %v901_v57 }
 0xb70   :  { %v900_v60 = vpop.xlane.xlu0 %899 }
 0xb71   :  { %v904_v61 = vmul.f32 %v900_v60, %v1854_v28 }
 0xb73   :  { %v906_v63 = vadd.f32 1e-05, %v904_v61 }
 0xb75   :  { %1615 = vrsqrt.f32 %v906_v63  ;;  %vm914_vm1 = vweird.f32 %v906_v63 }
 0xb78   :  { %v903_v0 = vpop.xlane.xlu0 %902 }
 0xb79   :  { %v905_v1 = vmul.f32 %v903_v0, %v1854_v28 }
 0xb7b   :  { %v1616_v2 = vpop.eup %1615  ;;  %v907_v3 = vadd.f32 1e-05, %v905_v1 }
 0xb7c   :  { %v909_v4 = vmul.f32 %v1616_v2, %v906_v63  ;;  %vm915_vm15 = vweird.f32 %v1616_v2 }
 0xb7d   :  { %1617 = vrsqrt.f32 %v907_v3  ;;  %vm916_vm2 = vmor %vm914_vm1, %vm915_vm15  ;;  %vm924_vm4 = vweird.f32 %v907_v3 }
 0xb7e   :  { %v910_v5 = vmul.f32 %v1616_v2, %v909_v4 }
 0xb80   :  { %v911_v6 = vmul.f32 0.5, %v910_v5 }
 0xb82   :  { %v912_v7 = vsub.f32 1.5, %v911_v6 }
 0xb83   :  { %v1618_v8 = vpop.eup %1617 }
 0xb84   :  { %v913_v9 = vmul.f32 %v1616_v2, %v912_v7  ;;  %v919_v10 = vmul.f32 %v1618_v8, %v907_v3  ;;  %vm925_vm3 = vweird.f32 %v1618_v8 }
 0xb85   :  { %vm926_vm5 = vmor %vm924_vm4, %vm925_vm3 }
 0xb86   :  { %v920_v11 = vmul.f32 %v1618_v8, %v919_v10  ;;  %v917_v14 = vsel %vm916_vm2, %v1616_v2, %v913_v9 }
 0xb87   :  { %v928_v18 = vmul.f32 %v917_v14, %v894_v49 }
 0xb88   :  { %v921_v15 = vmul.f32 0.5, %v920_v11 }
 0xb89   :  { %v933_v36 = vmul.f32 %v1578_v17, %v928_v18 }
 0xb8a   :  { %v922_v16 = vsub.f32 1.5, %v921_v15 }
 0xb8b   :  { %v938_v23 = vadd.f32 %v1579_v35, %v933_v36 }
 0xb8c   :  { %v923_v19 = vmul.f32 %v1618_v8, %v922_v16  ;;  %v1566_v16 = vld [vmem:[%s2131_s14 + $0x18] sm:$0xff] }
 0xb8d   :  { %1212 = vmatpush.bf16.msra.mxu1 %v1566_v16 }
 0xb8e   :  { %v927_v20 = vsel %vm926_vm5, %v1618_v8, %v923_v19  ;;  %v1565_v19 = vld [vmem:[%s2131_s14 + $0x10] sm:$0xff] }
 0xb8f   :  { %v929_v21 = vmul.f32 %v927_v20, %v895_v54 }
 0xb91   :  { %v934_v22 = vmul.f32 %v1578_v17, %v929_v21  ;;  %1213 = vmatpush.bf16.msra.mxu1 %v1565_v19 }
 0xb93   :  { %v939_v42 = vadd.f32 %v1579_v35, %v934_v22  ;;  %v1564_v35 = vld [vmem:[%s2131_s14 + $0x8] sm:$0xff]  ;;  %v1563_v22 = vld [vmem:[%s2131_s14] sm:$0xff] }
 0xb95   :  { %v940_v24 = vpack.c.bf16 %v939_v42, %v938_v23  ;;  %1214 = vmatpush.bf16.msra.mxu1 %v1564_v35 }
 0xb97   :  { %1446 = vmatmul.msk.bf16.vlgmr.msra.gmra.mxu0 %vm115_vm0, %v940_v24 }
 0xb99   :  { %1215 = vmatpush.bf16.msra.mxu1 %v1563_v22 }
 0xc14   :  { %v991_v33 = vpop.f32.mrf.mxu0 }
 0xc15   :  { %v992_v34 = vadd.f32 %v1580_v13, %v991_v33 }
 0xc17   :  { %v996_v37 = vmul.f32 %v992_v34, %v992_v34 }
 0xc19   :  { %v998_v38 = vmul.f32 %v996_v37, %v992_v34 }
 0xc1b   :  { %v1000_v39 = vmul.f32 0.044715, %v998_v38  ;;  %v1583_v38 = vld [vmem:[%s2130_s13 + $0x1] ss:$0 sm:$0xff]  ;;  %s1655_s13 = smov [#allocation2]  }
 0xc1c   :  { %v993_v40 = vpop.f32.mrf.mxu0  ;;  %s1227_s25 = sshll.u32 %s1655_s13, 4  ;;  %s1228_s25 = int_to_ptr.vmem [resolvable:$true] %s1227_s25 }
 0xc1d   :  { %v1002_v41 = vadd.f32 %v1000_v39, %v992_v34  ;;  %v994_v43 = vadd.f32 %v1580_v13, %v993_v40 }
 0xc1f   :  { %v1004_v44 = vmul.f32 0.7978846, %v1002_v41  ;;  %v997_v45 = vmul.f32 %v994_v43, %v994_v43 }
 0xc21   :  { %v999_v46 = vmul.f32 %v997_v45, %v994_v43  ;;  %1619 = vtanh.f32 %v1004_v44 }
 0xc23   :  { %v1001_v47 = vmul.f32 0.044715, %v999_v46 }
 0xc25   :  { %v1003_v48 = vadd.f32 %v1001_v47, %v994_v43 }
 0xc27   :  { %v1005_v49 = vmul.f32 0.7978846, %v1003_v48  ;;  %v1620_v50 = vpop.eup %1619 }
 0xc28   :  { %v1008_v51 = vadd.f32 1.0, %v1620_v50 }
 0xc29   :  { %1621 = vtanh.f32 %v1005_v49 }
 0xc2a   :  { %v1010_v53 = vmul.f32 0.5, %v1008_v51 }
 0xc2c   :  { %v1012_v57 = vmul.f32 %v1010_v53, %v992_v34  ;;  %v1584_v53 = vld [vmem:[%s2132_s15] ss:$0 sm:$0xff] }
 0xc2f   :  { %v1622_v52 = vpop.eup %1621 }
 0xc30   :  { %v1009_v54 = vadd.f32 1.0, %v1622_v52 }
 0xc32   :  { %v1011_v56 = vmul.f32 0.5, %v1009_v54 }
 0xc34   :  { %v1013_v55 = vmul.f32 %v1011_v56, %v994_v43 }
 0xc36   :  { %v1014_v58 = vpack.c.bf16 %v1013_v55, %v1012_v57 }
 0xc38   :  { %1093 = vmatmul.bf16.vlgmr.msra.gmra.mxu3 %v1014_v58 }
 0xcbb   :  { %v1094_v60 = vpop.f32.mrf.mxu3 }
 0xcbc   :  { %v1095_v61 = vadd.f32 %v1581_v59, %v1094_v60 }
 0xcbe   :  { %v1099_v62 = vadd.f32 %v1095_v61, %v938_v23 }
 0xcc0   :  { %v1105_v63 = vsel %vm115_vm0, %v1099_v62, 0.0 }
 0xcc1   :  { %1106 = vadd.xlane.f32.xlu0 %v1105_v63 }
 0xcc3   :  { %v1096_v0 = vpop.f32.mrf.mxu3 }
 0xcc4   :  { %v1097_v1 = vadd.f32 %v1581_v59, %v1096_v0 }
 0xcc6   :  { %v1100_v2 = vadd.f32 %v1097_v1, %v939_v42 }
 0xcc8   :  { %v1108_v3 = vsel %vm115_vm0, %v1100_v2, 0.0 }
 0xcc9   :  { %1109 = vadd.xlane.f32.xlu2 %v1108_v3 }
 0xd34   :  { %v1107_v4 = vpop.xlane.xlu0 %1106 }
 0xd35   :  { %v1111_v5 = vmul.f32 %v1107_v4, %v1854_v28 }
 0xd37   :  { %v1113_v6 = vsub.f32 %v1099_v62, %v1111_v5 }
 0xd39   :  { %v1115_v7 = vmul.f32 %v1113_v6, %v1113_v6 }
 0xd3b   :  { %v1117_v8 = vsel %vm115_vm0, %v1115_v7, 0.0 }
 0xd3c   :  { %v1110_v9 = vpop.xlane.xlu2 %1109  ;;  %1118 = vadd.xlane.f32.xlu0 %v1117_v8 }
 0xd3d   :  { %v1112_v10 = vmul.f32 %v1110_v9, %v1854_v28 }
 0xd3f   :  { %v1114_v11 = vsub.f32 %v1100_v2, %v1112_v10 }
 0xd41   :  { %v1116_v14 = vmul.f32 %v1114_v11, %v1114_v11 }
 0xd43   :  { %v1120_v15 = vsel %vm115_vm0, %v1116_v14, 0.0 }
 0xd44   :  { %1121 = vadd.xlane.f32.xlu2 %v1120_v15 }
 0xdaf   :  { %v1119_v17 = vpop.xlane.xlu0 %1118 }
 0xdb0   :  { %v1123_v18 = vmul.f32 %v1119_v17, %v1854_v28 }
 0xdb2   :  { %v1125_v20 = vadd.f32 1e-05, %v1123_v18 }
 0xdb4   :  { %1623 = vrsqrt.f32 %v1125_v20  ;;  %vm1133_vm7 = vweird.f32 %v1125_v20 }
 0xdb7   :  { %v1122_v36 = vpop.xlane.xlu2 %1121 }
 0xdb8   :  { %v1124_v21 = vmul.f32 %v1122_v36, %v1854_v28 }
 0xdba   :  { %v1624_v23 = vpop.eup %1623  ;;  %v1126_v42 = vadd.f32 1e-05, %v1124_v21 }
 0xdbb   :  { %v1128_v24 = vmul.f32 %v1624_v23, %v1125_v20  ;;  %vm1134_vm6 = vweird.f32 %v1624_v23 }
 0xdbc   :  { %1625 = vrsqrt.f32 %v1126_v42  ;;  %vm1135_vm8 = vmor %vm1133_vm7, %vm1134_vm6  ;;  %vm1143_vm10 = vweird.f32 %v1126_v42 }
 0xdbd   :  { %v1129_v25 = vmul.f32 %v1624_v23, %v1128_v24 }
 0xdbf   :  { %v1130_v26 = vmul.f32 0.5, %v1129_v25 }
 0xdc1   :  { %v1131_v27 = vsub.f32 1.5, %v1130_v26 }
 0xdc2   :  { %v1626_v12 = vpop.eup %1625 }
 0xdc3   :  { %v1132_v29 = vmul.f32 %v1624_v23, %v1131_v27  ;;  %v1138_v30 = vmul.f32 %v1626_v12, %v1126_v42  ;;  %vm1144_vm9 = vweird.f32 %v1626_v12 }
 0xdc4   :  { %vm1145_vm11 = vmor %vm1143_vm10, %vm1144_vm9 }
 0xdc5   :  { %v1136_v31 = vsel %vm1135_vm8, %v1624_v23, %v1132_v29  ;;  %v1139_v28 = vmul.f32 %v1626_v12, %v1138_v30 }
 0xdc6   :  { %v1147_v33 = vmul.f32 %v1136_v31, %v1113_v6 }
 0xdc7   :  { %v1140_v13 = vmul.f32 0.5, %v1139_v28 }
 0xdc8   :  { %v1152_v39 = vmul.f32 %v1582_v32, %v1147_v33 }
 0xdc9   :  { %v1141_v34 = vsub.f32 1.5, %v1140_v13 }
 0xdca   :  { %v1157_v43 = vadd.f32 %v1583_v38, %v1152_v39 }
 0xdcb   :  { %v1142_v37 = vmul.f32 %v1626_v12, %v1141_v34 }
 0xdcc   :  { %v1159_v46 = vpack.c.bf16 %v1157_v43, %v1157_v43 }
 0xdcd   :  { %v1146_v40 = vsel %vm1145_vm11, %v1626_v12, %v1142_v37 }
 0xdce   :  { %v1148_v41 = vmul.f32 %v1146_v40, %v1114_v11  ;;  %v1175_v49 = vunpack.c.l.b16 %v1159_v46 }
 0xdd0   :  { %v1153_v44 = vmul.f32 %v1582_v32, %v1148_v41 }
 0xdd2   :  { %v1158_v45 = vadd.f32 %v1583_v38, %v1153_v44 }
 0xdd4   :  { %v1160_v47 = vpack.c.bf16 %v1158_v45, %v1158_v45 }
 0xdd6   :  { %v1176_v48 = vunpack.c.l.b16 %v1160_v47 }
 0xdd8   :  { %v1177_v50 = vrot.slane %v1176_v48, 7 }
 0xdda   :  { %v1179_v51 = vsel %vm1178_vm12, %v1177_v50, %v1175_v49 }
 0xddb   :  { %v1180_v52 = vpack.c.b16 %v1179_v51, %v1179_v51 }
 0xddd   :  { %1514 = vmatmul.msk.bf16.vlgmr.msra.gmra.mxu1 %vm115_vm0, %v1180_v52 }
 0xe5a   :  { %v1217_v54 = vpop.f32.mrf.mxu1 }
 0xe5b   :  { %v1218_v56 = vadd.f32 %v1584_v53, %v1217_v54 }
 0xe5d   :  { %1221 = vst [vmem:[#allocation2] sm:$0x3] %v1218_v56 }
 0xe5e   :  { %1232 = dma.vmem_to_hbm [thread:$0]  %s1228_s25, 32, %s1230_s28, [#allocation3]  }
 0xe62   :  { %v1219_v57 = vpop.f32.mrf.mxu1 }
 0xe63   :  { %1651 = dma.done.wait [#allocation3], 32  }
 0xe64   :  { %1652 = vsyncadd [#allocation3], 4294967264 }
 0xe65   :  { %1237 = vsyncpa [#allocation3], 1 }

</bundles_post_ra>
